<compile_context>
chip_gen: v6e
topology: v6e:2x2x1
jax: 0.10.0
libtpu: 0.0.40
codegen_flags: <defaults>
</compile_context>

<pallas_src>
import functools
import itertools

import jax
import jax.numpy as jnp
from jax.experimental import pallas as pl
from jax.experimental.pallas import tpu as pltpu

_LANE = 128
_SUBLANE = 8


def library_size(latent_dim, poly_order, include_sine):
    """Number of columns in the SINDy feature library."""
    n = 1 + latent_dim  # constant + linear
    for order in range(2, poly_order + 1):
        n += sum(1 for _ in itertools.combinations_with_replacement(
            range(latent_dim), order))
    if include_sine:
        n += latent_dim
    return n


def _poly_indices(latent_dim, poly_order):
    """Static list of index tuples for polynomial terms of order >= 2."""
    out = []
    for order in range(2, poly_order + 1):
        out.extend(itertools.combinations_with_replacement(range(latent_dim),
                                                           order))
    return out


def _round_up(x, m):
    return ((x + m - 1) // m) * m


def _prefix_product(idx, h_rows, cache):
    """Memoized product h[idx[0]] * ... * h[idx[-1]] (idx is sorted)."""
    if idx in cache:
        return cache[idx]
    if len(idx) == 1:
        term = h_rows[idx[0]]
    else:
        term = _prefix_product(idx[:-1], h_rows, cache) * h_rows[idx[-1]]
    cache[idx] = term
    return term


def _sindy_kernel(xi_ref, ht_ref, out_ref, *, latent_dim, poly_order,
                  include_sine):
    """One batch tile: out^T = h^T + sum_l xi[l, :] * theta_l(h^T).

    ht_ref / out_ref : (latent_dim, SB, 128)   -- batch on (sublane, lane)
    xi_ref           : SMEM (L * latent_dim,)  -- (coefficients*mask*dt) flat
    """
    D = latent_dim
    ht = ht_ref[...].astype(jnp.float32)            # (D, SB, 128)
    h_rows = [ht[d] for d in range(D)]              # each (SB, 128)

    def xi(l, d):
        return xi_ref[l * D + d]                    # SMEM scalar read

    term_idx = 0

    # Euler update: accumulators start from h; constant term folds into the
    # first broadcast add.
    acc = [h_rows[d] + xi(term_idx, d) for d in range(D)]
    term_idx += 1

    # linear terms
    for i in range(D):
        for d in range(D):
            acc[d] = acc[d] + xi(term_idx, d) * h_rows[i]
        term_idx += 1

    # polynomial terms (order >= 2), same enumeration as sindy_library;
    # prefix products are shared across orders at trace time.
    prod_cache = {}
    for idx in _poly_indices(D, poly_order):
        term = _prefix_product(idx, h_rows, prod_cache)
        for d in range(D):
            acc[d] = acc[d] + xi(term_idx, d) * term
        term_idx += 1

    # sine terms: one EUP pass over the full tile, then slice rows
    if include_sine:
        sin_ht = jnp.sin(ht)                        # (D, SB, 128)
        for i in range(D):
            s = sin_ht[i]
            for d in range(D):
                acc[d] = acc[d] + xi(term_idx, d) * s
            term_idx += 1

    for d in range(D):
        out_ref[d] = acc[d].astype(out_ref.dtype)


@functools.partial(jax.jit,
                   static_argnames=("poly_order", "include_sine", "batch_tile"))
def sindy_forward(h, coefficients, coefficient_mask, dt, *,
                  poly_order, include_sine, batch_tile=2048):
    """Pallas-backed SINDy.forward(h, dt)."""
    B, D = h.shape
    L = coefficients.shape[0]

    # Fold mask and dt into the coefficients once, outside the kernel.
    xi = (coefficients * coefficient_mask).astype(jnp.float32) \
        * jnp.asarray(dt, dtype=jnp.float32)
    xi_flat = xi.reshape(L * D)

    # Pick the batch tile (batch maps to (sublane, lane) inside the kernel).
    if B <= batch_tile:
        tb = _round_up(max(B, 1), _LANE)                          # one block
    else:
        tb = max(_SUBLANE * _LANE,
                 (batch_tile // (_SUBLANE * _LANE)) * (_SUBLANE * _LANE))
    bp = _round_up(B, tb)
    sb = tb // _LANE
    num_tiles = bp // tb

    # Lane-dense layout: (B, D) -> (D, B) -> pad -> (D, bp/128, 128).
    ht = jnp.transpose(h)                                         # (D, B)
    ht = jnp.pad(ht, ((0, 0), (0, bp - B)))                       # (D, bp)
    ht = ht.reshape(D, bp // _LANE, _LANE)

    kernel = functools.partial(_sindy_kernel, latent_dim=D,
                               poly_order=poly_order,
                               include_sine=include_sine)

    out3 = pl.pallas_call(
        kernel,
        out_shape=jax.ShapeDtypeStruct((D, bp // _LANE, _LANE), h.dtype),
        grid=(num_tiles,),
        in_specs=[
            pl.BlockSpec(memory_space=pltpu.SMEM),                # xi (L*D,)
            pl.BlockSpec((D, sb, _LANE), lambda i: (0, i, 0)),    # h^T tile
        ],
        out_specs=pl.BlockSpec((D, sb, _LANE), lambda i: (0, i, 0)),
        input_output_aliases={1: 0},
        compiler_params=pltpu.CompilerParams(
            dimension_semantics=("parallel",)),
    )(xi_flat, ht)

    out_t = out3.reshape(D, bp)[:, :B]                            # (D, B)
    return jnp.transpose(out_t)                                   # (B, D)


# ----------------------------- pure-JAX reference -----------------------------

def _build_library(h, latent_dim, poly_order, include_sine):
    B = h.shape[0]
    cols = [jnp.ones((B, 1), dtype=h.dtype)]
    for i in range(latent_dim):
        cols.append(h[:, i:i + 1])
    for idx in _poly_indices(latent_dim, poly_order):
        term = h[:, idx[0]:idx[0] + 1]
        for j in idx[1:]:
            term = term * h[:, j:j + 1]
        cols.append(term)
    if include_sine:
        for i in range(latent_dim):
            cols.append(jnp.sin(h[:, i:i + 1]))
    return jnp.concatenate(cols, axis=1)


def sindy_forward_ref(h, coefficients, coefficient_mask, dt, *,
                      poly_order, include_sine):
    theta = _build_library(h, h.shape[1], poly_order, include_sine)
    return h + theta @ (coefficients * coefficient_mask) * dt


if __name__ == "__main__":
    latent_dim = 4
    include_sine = True
    dt = 0.01

    key = jax.random.PRNGKey(0)
    k_h, k_c, k_h2, k_c3 = jax.random.split(key, 4)

    # --- small case (single block), poly_order=2 ---
    poly_order = 2
    library_dim = library_size(latent_dim, poly_order, include_sine)  # = 19
    coefficients = 0.001 * jax.random.normal(
        k_c, (library_dim, latent_dim), dtype=jnp.float32)
    coefficient_mask = jnp.ones((library_dim, latent_dim), dtype=jnp.float32)

    batch = 8
    h = jax.random.normal(k_h, (batch, latent_dim), dtype=jnp.float32)
    out = sindy_forward(h, coefficients, coefficient_mask, dt,
                        poly_order=poly_order, include_sine=include_sine)
    out = jax.block_until_ready(out)
    ref = sindy_forward_ref(h, coefficients, coefficient_mask, dt,
                            poly_order=poly_order, include_sine=include_sine)
    assert out.shape == (batch, latent_dim)
    assert jnp.allclose(out, ref, atol=1e-5, rtol=1e-5), "small-case mismatch"

    # --- larger case exercising the batch grid (3 tiles) + padding ---
    batch2 = 2500
    h2 = jax.random.normal(k_h2, (batch2, latent_dim), dtype=jnp.float32)
    out2 = sindy_forward(h2, coefficients, coefficient_mask, dt,
                         poly_order=poly_order, include_sine=include_sine,
                         batch_tile=1024)
    out2 = jax.block_until_ready(out2)
    ref2 = sindy_forward_ref(h2, coefficients, coefficient_mask, dt,
                             poly_order=poly_order, include_sine=include_sine)
    assert out2.shape == (batch2, latent_dim)
    assert jnp.allclose(out2, ref2, atol=1e-5, rtol=1e-5), "grid-case mismatch"

    # --- poly_order=3 case (exercises shared prefix products) ---
    poly_order3 = 3
    library_dim3 = library_size(latent_dim, poly_order3, include_sine)  # = 39
    coefficients3 = 0.001 * jax.random.normal(
        k_c3, (library_dim3, latent_dim), dtype=jnp.float32)
    coefficient_mask3 = jnp.ones((library_dim3, latent_dim), dtype=jnp.float32)
    out3 = sindy_forward(h, coefficients3, coefficient_mask3, dt,
                         poly_order=poly_order3, include_sine=include_sine)
    out3 = jax.block_until_ready(out3)
    ref3 = sindy_forward_ref(h, coefficients3, coefficient_mask3, dt,
                             poly_order=poly_order3, include_sine=include_sine)
    assert jnp.allclose(out3, ref3, atol=1e-5, rtol=1e-5), "order-3 mismatch"

    print("KERNEL_OK")
</pallas_src>

<mosaic_0001>
module attributes {stable_mosaic.version = 11 : i64} {
  func.func @_sindy_kernel(%arg0: i32, %arg1: memref<76xf32, #tpu.memory_space<smem>>, %arg2: memref<4x1x128xf32, #tpu.memory_space<vmem>>, %arg3: memref<4x1x128xf32, #tpu.memory_space<vmem>>) attributes {dimension_semantics = [#tpu.dimension_semantics<parallel>], iteration_bounds = array<i64: 1>, scalar_prefetch = 0 : i64, scratch_operands = 0 : i64, tpu.core_type = #tpu.core_type<tc>, window_params = [{transform_indices = @transform_0, window_bounds = array<i64: 76>}, {transform_indices = @transform_1, window_bounds = array<i64: 4, 1, 128>}, {transform_indices = @transform_2, window_bounds = array<i64: 4, 1, 128>}]} {
    %c0 = arith.constant 0 : index
    %c0_0 = arith.constant 0 : index
    %c0_1 = arith.constant 0 : index
    %0 = vector.load %arg2[%c0, %c0_0, %c0_1] : memref<4x1x128xf32, #tpu.memory_space<vmem>>, vector<4x1x128xf32>
    %1 = vector.extract_strided_slice %0 {offsets = [0, 0, 0], sizes = [1, 1, 128], strides = [1, 1, 1]} : vector<4x1x128xf32> to vector<1x1x128xf32>
    %2 = vector.shape_cast %1 : vector<1x1x128xf32> to vector<1x128xf32>
    %3 = vector.extract_strided_slice %0 {offsets = [1, 0, 0], sizes = [1, 1, 128], strides = [1, 1, 1]} : vector<4x1x128xf32> to vector<1x1x128xf32>
    %4 = vector.shape_cast %3 : vector<1x1x128xf32> to vector<1x128xf32>
    %5 = vector.extract_strided_slice %0 {offsets = [2, 0, 0], sizes = [1, 1, 128], strides = [1, 1, 1]} : vector<4x1x128xf32> to vector<1x1x128xf32>
    %6 = vector.shape_cast %5 : vector<1x1x128xf32> to vector<1x128xf32>
    %7 = vector.extract_strided_slice %0 {offsets = [3, 0, 0], sizes = [1, 1, 128], strides = [1, 1, 1]} : vector<4x1x128xf32> to vector<1x1x128xf32>
    %8 = vector.shape_cast %7 : vector<1x1x128xf32> to vector<1x128xf32>
    %c0_2 = arith.constant 0 : index
    %9 = memref.load %arg1[%c0_2] : memref<76xf32, #tpu.memory_space<smem>>
    %10 = vector.broadcast %9 : f32 to vector<1x128xf32>
    %11 = arith.addf %2, %10 : vector<1x128xf32>
    %c1 = arith.constant 1 : index
    %12 = memref.load %arg1[%c1] : memref<76xf32, #tpu.memory_space<smem>>
    %13 = vector.broadcast %12 : f32 to vector<1x128xf32>
    %14 = arith.addf %4, %13 : vector<1x128xf32>
    %c2 = arith.constant 2 : index
    %15 = memref.load %arg1[%c2] : memref<76xf32, #tpu.memory_space<smem>>
    %16 = vector.broadcast %15 : f32 to vector<1x128xf32>
    %17 = arith.addf %6, %16 : vector<1x128xf32>
    %c3 = arith.constant 3 : index
    %18 = memref.load %arg1[%c3] : memref<76xf32, #tpu.memory_space<smem>>
    %19 = vector.broadcast %18 : f32 to vector<1x128xf32>
    %20 = arith.addf %8, %19 : vector<1x128xf32>
    %c4 = arith.constant 4 : index
    %21 = memref.load %arg1[%c4] : memref<76xf32, #tpu.memory_space<smem>>
    %22 = vector.broadcast %21 : f32 to vector<1x128xf32>
    %23 = arith.mulf %22, %2 : vector<1x128xf32>
    %24 = arith.addf %11, %23 : vector<1x128xf32>
    %c5 = arith.constant 5 : index
    %25 = memref.load %arg1[%c5] : memref<76xf32, #tpu.memory_space<smem>>
    %26 = vector.broadcast %25 : f32 to vector<1x128xf32>
    %27 = arith.mulf %26, %2 : vector<1x128xf32>
    %28 = arith.addf %14, %27 : vector<1x128xf32>
    %c6 = arith.constant 6 : index
    %29 = memref.load %arg1[%c6] : memref<76xf32, #tpu.memory_space<smem>>
    %30 = vector.broadcast %29 : f32 to vector<1x128xf32>
    %31 = arith.mulf %30, %2 : vector<1x128xf32>
    %32 = arith.addf %17, %31 : vector<1x128xf32>
    %c7 = arith.constant 7 : index
    %33 = memref.load %arg1[%c7] : memref<76xf32, #tpu.memory_space<smem>>
    %34 = vector.broadcast %33 : f32 to vector<1x128xf32>
    %35 = arith.mulf %34, %2 : vector<1x128xf32>
    %36 = arith.addf %20, %35 : vector<1x128xf32>
    %c8 = arith.constant 8 : index
    %37 = memref.load %arg1[%c8] : memref<76xf32, #tpu.memory_space<smem>>
    %38 = vector.broadcast %37 : f32 to vector<1x128xf32>
    %39 = arith.mulf %38, %4 : vector<1x128xf32>
    %40 = arith.addf %24, %39 : vector<1x128xf32>
    %c9 = arith.constant 9 : index
    %41 = memref.load %arg1[%c9] : memref<76xf32, #tpu.memory_space<smem>>
    %42 = vector.broadcast %41 : f32 to vector<1x128xf32>
    %43 = arith.mulf %42, %4 : vector<1x128xf32>
    %44 = arith.addf %28, %43 : vector<1x128xf32>
    %c10 = arith.constant 10 : index
    %45 = memref.load %arg1[%c10] : memref<76xf32, #tpu.memory_space<smem>>
    %46 = vector.broadcast %45 : f32 to vector<1x128xf32>
    %47 = arith.mulf %46, %4 : vector<1x128xf32>
    %48 = arith.addf %32, %47 : vector<1x128xf32>
    %c11 = arith.constant 11 : index
    %49 = memref.load %arg1[%c11] : memref<76xf32, #tpu.memory_space<smem>>
    %50 = vector.broadcast %49 : f32 to vector<1x128xf32>
    %51 = arith.mulf %50, %4 : vector<1x128xf32>
    %52 = arith.addf %36, %51 : vector<1x128xf32>
    %c12 = arith.constant 12 : index
    %53 = memref.load %arg1[%c12] : memref<76xf32, #tpu.memory_space<smem>>
    %54 = vector.broadcast %53 : f32 to vector<1x128xf32>
    %55 = arith.mulf %54, %6 : vector<1x128xf32>
    %56 = arith.addf %40, %55 : vector<1x128xf32>
    %c13 = arith.constant 13 : index
    %57 = memref.load %arg1[%c13] : memref<76xf32, #tpu.memory_space<smem>>
    %58 = vector.broadcast %57 : f32 to vector<1x128xf32>
    %59 = arith.mulf %58, %6 : vector<1x128xf32>
    %60 = arith.addf %44, %59 : vector<1x128xf32>
    %c14 = arith.constant 14 : index
    %61 = memref.load %arg1[%c14] : memref<76xf32, #tpu.memory_space<smem>>
    %62 = vector.broadcast %61 : f32 to vector<1x128xf32>
    %63 = arith.mulf %62, %6 : vector<1x128xf32>
    %64 = arith.addf %48, %63 : vector<1x128xf32>
    %c15 = arith.constant 15 : index
    %65 = memref.load %arg1[%c15] : memref<76xf32, #tpu.memory_space<smem>>
    %66 = vector.broadcast %65 : f32 to vector<1x128xf32>
    %67 = arith.mulf %66, %6 : vector<1x128xf32>
    %68 = arith.addf %52, %67 : vector<1x128xf32>
    %c16 = arith.constant 16 : index
    %69 = memref.load %arg1[%c16] : memref<76xf32, #tpu.memory_space<smem>>
    %70 = vector.broadcast %69 : f32 to vector<1x128xf32>
    %71 = arith.mulf %70, %8 : vector<1x128xf32>
    %72 = arith.addf %56, %71 : vector<1x128xf32>
    %c17 = arith.constant 17 : index
    %73 = memref.load %arg1[%c17] : memref<76xf32, #tpu.memory_space<smem>>
    %74 = vector.broadcast %73 : f32 to vector<1x128xf32>
    %75 = arith.mulf %74, %8 : vector<1x128xf32>
    %76 = arith.addf %60, %75 : vector<1x128xf32>
    %c18 = arith.constant 18 : index
    %77 = memref.load %arg1[%c18] : memref<76xf32, #tpu.memory_space<smem>>
    %78 = vector.broadcast %77 : f32 to vector<1x128xf32>
    %79 = arith.mulf %78, %8 : vector<1x128xf32>
    %80 = arith.addf %64, %79 : vector<1x128xf32>
    %c19 = arith.constant 19 : index
    %81 = memref.load %arg1[%c19] : memref<76xf32, #tpu.memory_space<smem>>
    %82 = vector.broadcast %81 : f32 to vector<1x128xf32>
    %83 = arith.mulf %82, %8 : vector<1x128xf32>
    %84 = arith.addf %68, %83 : vector<1x128xf32>
    %85 = arith.mulf %2, %2 : vector<1x128xf32>
    %c20 = arith.constant 20 : index
    %86 = memref.load %arg1[%c20] : memref<76xf32, #tpu.memory_space<smem>>
    %87 = vector.broadcast %86 : f32 to vector<1x128xf32>
    %88 = arith.mulf %87, %85 : vector<1x128xf32>
    %89 = arith.addf %72, %88 : vector<1x128xf32>
    %c21 = arith.constant 21 : index
    %90 = memref.load %arg1[%c21] : memref<76xf32, #tpu.memory_space<smem>>
    %91 = vector.broadcast %90 : f32 to vector<1x128xf32>
    %92 = arith.mulf %91, %85 : vector<1x128xf32>
    %93 = arith.addf %76, %92 : vector<1x128xf32>
    %c22 = arith.constant 22 : index
    %94 = memref.load %arg1[%c22] : memref<76xf32, #tpu.memory_space<smem>>
    %95 = vector.broadcast %94 : f32 to vector<1x128xf32>
    %96 = arith.mulf %95, %85 : vector<1x128xf32>
    %97 = arith.addf %80, %96 : vector<1x128xf32>
    %c23 = arith.constant 23 : index
    %98 = memref.load %arg1[%c23] : memref<76xf32, #tpu.memory_space<smem>>
    %99 = vector.broadcast %98 : f32 to vector<1x128xf32>
    %100 = arith.mulf %99, %85 : vector<1x128xf32>
    %101 = arith.addf %84, %100 : vector<1x128xf32>
    %102 = arith.mulf %2, %4 : vector<1x128xf32>
    %c24 = arith.constant 24 : index
    %103 = memref.load %arg1[%c24] : memref<76xf32, #tpu.memory_space<smem>>
    %104 = vector.broadcast %103 : f32 to vector<1x128xf32>
    %105 = arith.mulf %104, %102 : vector<1x128xf32>
    %106 = arith.addf %89, %105 : vector<1x128xf32>
    %c25 = arith.constant 25 : index
    %107 = memref.load %arg1[%c25] : memref<76xf32, #tpu.memory_space<smem>>
    %108 = vector.broadcast %107 : f32 to vector<1x128xf32>
    %109 = arith.mulf %108, %102 : vector<1x128xf32>
    %110 = arith.addf %93, %109 : vector<1x128xf32>
    %c26 = arith.constant 26 : index
    %111 = memref.load %arg1[%c26] : memref<76xf32, #tpu.memory_space<smem>>
    %112 = vector.broadcast %111 : f32 to vector<1x128xf32>
    %113 = arith.mulf %112, %102 : vector<1x128xf32>
    %114 = arith.addf %97, %113 : vector<1x128xf32>
    %c27 = arith.constant 27 : index
    %115 = memref.load %arg1[%c27] : memref<76xf32, #tpu.memory_space<smem>>
    %116 = vector.broadcast %115 : f32 to vector<1x128xf32>
    %117 = arith.mulf %116, %102 : vector<1x128xf32>
    %118 = arith.addf %101, %117 : vector<1x128xf32>
    %119 = arith.mulf %2, %6 : vector<1x128xf32>
    %c28 = arith.constant 28 : index
    %120 = memref.load %arg1[%c28] : memref<76xf32, #tpu.memory_space<smem>>
    %121 = vector.broadcast %120 : f32 to vector<1x128xf32>
    %122 = arith.mulf %121, %119 : vector<1x128xf32>
    %123 = arith.addf %106, %122 : vector<1x128xf32>
    %c29 = arith.constant 29 : index
    %124 = memref.load %arg1[%c29] : memref<76xf32, #tpu.memory_space<smem>>
    %125 = vector.broadcast %124 : f32 to vector<1x128xf32>
    %126 = arith.mulf %125, %119 : vector<1x128xf32>
    %127 = arith.addf %110, %126 : vector<1x128xf32>
    %c30 = arith.constant 30 : index
    %128 = memref.load %arg1[%c30] : memref<76xf32, #tpu.memory_space<smem>>
    %129 = vector.broadcast %128 : f32 to vector<1x128xf32>
    %130 = arith.mulf %129, %119 : vector<1x128xf32>
    %131 = arith.addf %114, %130 : vector<1x128xf32>
    %c31 = arith.constant 31 : index
    %132 = memref.load %arg1[%c31] : memref<76xf32, #tpu.memory_space<smem>>
    %133 = vector.broadcast %132 : f32 to vector<1x128xf32>
    %134 = arith.mulf %133, %119 : vector<1x128xf32>
    %135 = arith.addf %118, %134 : vector<1x128xf32>
    %136 = arith.mulf %2, %8 : vector<1x128xf32>
    %c32 = arith.constant 32 : index
    %137 = memref.load %arg1[%c32] : memref<76xf32, #tpu.memory_space<smem>>
    %138 = vector.broadcast %137 : f32 to vector<1x128xf32>
    %139 = arith.mulf %138, %136 : vector<1x128xf32>
    %140 = arith.addf %123, %139 : vector<1x128xf32>
    %c33 = arith.constant 33 : index
    %141 = memref.load %arg1[%c33] : memref<76xf32, #tpu.memory_space<smem>>
    %142 = vector.broadcast %141 : f32 to vector<1x128xf32>
    %143 = arith.mulf %142, %136 : vector<1x128xf32>
    %144 = arith.addf %127, %143 : vector<1x128xf32>
    %c34 = arith.constant 34 : index
    %145 = memref.load %arg1[%c34] : memref<76xf32, #tpu.memory_space<smem>>
    %146 = vector.broadcast %145 : f32 to vector<1x128xf32>
    %147 = arith.mulf %146, %136 : vector<1x128xf32>
    %148 = arith.addf %131, %147 : vector<1x128xf32>
    %c35 = arith.constant 35 : index
    %149 = memref.load %arg1[%c35] : memref<76xf32, #tpu.memory_space<smem>>
    %150 = vector.broadcast %149 : f32 to vector<1x128xf32>
    %151 = arith.mulf %150, %136 : vector<1x128xf32>
    %152 = arith.addf %135, %151 : vector<1x128xf32>
    %153 = arith.mulf %4, %4 : vector<1x128xf32>
    %c36 = arith.constant 36 : index
    %154 = memref.load %arg1[%c36] : memref<76xf32, #tpu.memory_space<smem>>
    %155 = vector.broadcast %154 : f32 to vector<1x128xf32>
    %156 = arith.mulf %155, %153 : vector<1x128xf32>
    %157 = arith.addf %140, %156 : vector<1x128xf32>
    %c37 = arith.constant 37 : index
    %158 = memref.load %arg1[%c37] : memref<76xf32, #tpu.memory_space<smem>>
    %159 = vector.broadcast %158 : f32 to vector<1x128xf32>
    %160 = arith.mulf %159, %153 : vector<1x128xf32>
    %161 = arith.addf %144, %160 : vector<1x128xf32>
    %c38 = arith.constant 38 : index
    %162 = memref.load %arg1[%c38] : memref<76xf32, #tpu.memory_space<smem>>
    %163 = vector.broadcast %162 : f32 to vector<1x128xf32>
    %164 = arith.mulf %163, %153 : vector<1x128xf32>
    %165 = arith.addf %148, %164 : vector<1x128xf32>
    %c39 = arith.constant 39 : index
    %166 = memref.load %arg1[%c39] : memref<76xf32, #tpu.memory_space<smem>>
    %167 = vector.broadcast %166 : f32 to vector<1x128xf32>
    %168 = arith.mulf %167, %153 : vector<1x128xf32>
    %169 = arith.addf %152, %168 : vector<1x128xf32>
    %170 = arith.mulf %4, %6 : vector<1x128xf32>
    %c40 = arith.constant 40 : index
    %171 = memref.load %arg1[%c40] : memref<76xf32, #tpu.memory_space<smem>>
    %172 = vector.broadcast %171 : f32 to vector<1x128xf32>
    %173 = arith.mulf %172, %170 : vector<1x128xf32>
    %174 = arith.addf %157, %173 : vector<1x128xf32>
    %c41 = arith.constant 41 : index
    %175 = memref.load %arg1[%c41] : memref<76xf32, #tpu.memory_space<smem>>
    %176 = vector.broadcast %175 : f32 to vector<1x128xf32>
    %177 = arith.mulf %176, %170 : vector<1x128xf32>
    %178 = arith.addf %161, %177 : vector<1x128xf32>
    %c42 = arith.constant 42 : index
    %179 = memref.load %arg1[%c42] : memref<76xf32, #tpu.memory_space<smem>>
    %180 = vector.broadcast %179 : f32 to vector<1x128xf32>
    %181 = arith.mulf %180, %170 : vector<1x128xf32>
    %182 = arith.addf %165, %181 : vector<1x128xf32>
    %c43 = arith.constant 43 : index
    %183 = memref.load %arg1[%c43] : memref<76xf32, #tpu.memory_space<smem>>
    %184 = vector.broadcast %183 : f32 to vector<1x128xf32>
    %185 = arith.mulf %184, %170 : vector<1x128xf32>
    %186 = arith.addf %169, %185 : vector<1x128xf32>
    %187 = arith.mulf %4, %8 : vector<1x128xf32>
    %c44 = arith.constant 44 : index
    %188 = memref.load %arg1[%c44] : memref<76xf32, #tpu.memory_space<smem>>
    %189 = vector.broadcast %188 : f32 to vector<1x128xf32>
    %190 = arith.mulf %189, %187 : vector<1x128xf32>
    %191 = arith.addf %174, %190 : vector<1x128xf32>
    %c45 = arith.constant 45 : index
    %192 = memref.load %arg1[%c45] : memref<76xf32, #tpu.memory_space<smem>>
    %193 = vector.broadcast %192 : f32 to vector<1x128xf32>
    %194 = arith.mulf %193, %187 : vector<1x128xf32>
    %195 = arith.addf %178, %194 : vector<1x128xf32>
    %c46 = arith.constant 46 : index
    %196 = memref.load %arg1[%c46] : memref<76xf32, #tpu.memory_space<smem>>
    %197 = vector.broadcast %196 : f32 to vector<1x128xf32>
    %198 = arith.mulf %197, %187 : vector<1x128xf32>
    %199 = arith.addf %182, %198 : vector<1x128xf32>
    %c47 = arith.constant 47 : index
    %200 = memref.load %arg1[%c47] : memref<76xf32, #tpu.memory_space<smem>>
    %201 = vector.broadcast %200 : f32 to vector<1x128xf32>
    %202 = arith.mulf %201, %187 : vector<1x128xf32>
    %203 = arith.addf %186, %202 : vector<1x128xf32>
    %204 = arith.mulf %6, %6 : vector<1x128xf32>
    %c48 = arith.constant 48 : index
    %205 = memref.load %arg1[%c48] : memref<76xf32, #tpu.memory_space<smem>>
    %206 = vector.broadcast %205 : f32 to vector<1x128xf32>
    %207 = arith.mulf %206, %204 : vector<1x128xf32>
    %208 = arith.addf %191, %207 : vector<1x128xf32>
    %c49 = arith.constant 49 : index
    %209 = memref.load %arg1[%c49] : memref<76xf32, #tpu.memory_space<smem>>
    %210 = vector.broadcast %209 : f32 to vector<1x128xf32>
    %211 = arith.mulf %210, %204 : vector<1x128xf32>
    %212 = arith.addf %195, %211 : vector<1x128xf32>
    %c50 = arith.constant 50 : index
    %213 = memref.load %arg1[%c50] : memref<76xf32, #tpu.memory_space<smem>>
    %214 = vector.broadcast %213 : f32 to vector<1x128xf32>
    %215 = arith.mulf %214, %204 : vector<1x128xf32>
    %216 = arith.addf %199, %215 : vector<1x128xf32>
    %c51 = arith.constant 51 : index
    %217 = memref.load %arg1[%c51] : memref<76xf32, #tpu.memory_space<smem>>
    %218 = vector.broadcast %217 : f32 to vector<1x128xf32>
    %219 = arith.mulf %218, %204 : vector<1x128xf32>
    %220 = arith.addf %203, %219 : vector<1x128xf32>
    %221 = arith.mulf %6, %8 : vector<1x128xf32>
    %c52 = arith.constant 52 : index
    %222 = memref.load %arg1[%c52] : memref<76xf32, #tpu.memory_space<smem>>
    %223 = vector.broadcast %222 : f32 to vector<1x128xf32>
    %224 = arith.mulf %223, %221 : vector<1x128xf32>
    %225 = arith.addf %208, %224 : vector<1x128xf32>
    %c53 = arith.constant 53 : index
    %226 = memref.load %arg1[%c53] : memref<76xf32, #tpu.memory_space<smem>>
    %227 = vector.broadcast %226 : f32 to vector<1x128xf32>
    %228 = arith.mulf %227, %221 : vector<1x128xf32>
    %229 = arith.addf %212, %228 : vector<1x128xf32>
    %c54 = arith.constant 54 : index
    %230 = memref.load %arg1[%c54] : memref<76xf32, #tpu.memory_space<smem>>
    %231 = vector.broadcast %230 : f32 to vector<1x128xf32>
    %232 = arith.mulf %231, %221 : vector<1x128xf32>
    %233 = arith.addf %216, %232 : vector<1x128xf32>
    %c55 = arith.constant 55 : index
    %234 = memref.load %arg1[%c55] : memref<76xf32, #tpu.memory_space<smem>>
    %235 = vector.broadcast %234 : f32 to vector<1x128xf32>
    %236 = arith.mulf %235, %221 : vector<1x128xf32>
    %237 = arith.addf %220, %236 : vector<1x128xf32>
    %238 = arith.mulf %8, %8 : vector<1x128xf32>
    %c56 = arith.constant 56 : index
    %239 = memref.load %arg1[%c56] : memref<76xf32, #tpu.memory_space<smem>>
    %240 = vector.broadcast %239 : f32 to vector<1x128xf32>
    %241 = arith.mulf %240, %238 : vector<1x128xf32>
    %242 = arith.addf %225, %241 : vector<1x128xf32>
    %c57 = arith.constant 57 : index
    %243 = memref.load %arg1[%c57] : memref<76xf32, #tpu.memory_space<smem>>
    %244 = vector.broadcast %243 : f32 to vector<1x128xf32>
    %245 = arith.mulf %244, %238 : vector<1x128xf32>
    %246 = arith.addf %229, %245 : vector<1x128xf32>
    %c58 = arith.constant 58 : index
    %247 = memref.load %arg1[%c58] : memref<76xf32, #tpu.memory_space<smem>>
    %248 = vector.broadcast %247 : f32 to vector<1x128xf32>
    %249 = arith.mulf %248, %238 : vector<1x128xf32>
    %250 = arith.addf %233, %249 : vector<1x128xf32>
    %c59 = arith.constant 59 : index
    %251 = memref.load %arg1[%c59] : memref<76xf32, #tpu.memory_space<smem>>
    %252 = vector.broadcast %251 : f32 to vector<1x128xf32>
    %253 = arith.mulf %252, %238 : vector<1x128xf32>
    %254 = arith.addf %237, %253 : vector<1x128xf32>
    %255 = math.sin %0 : vector<4x1x128xf32>
    %256 = vector.extract_strided_slice %255 {offsets = [0, 0, 0], sizes = [1, 1, 128], strides = [1, 1, 1]} : vector<4x1x128xf32> to vector<1x1x128xf32>
    %257 = vector.shape_cast %256 : vector<1x1x128xf32> to vector<1x128xf32>
    %c60 = arith.constant 60 : index
    %258 = memref.load %arg1[%c60] : memref<76xf32, #tpu.memory_space<smem>>
    %259 = vector.broadcast %258 : f32 to vector<1x128xf32>
    %260 = arith.mulf %259, %257 : vector<1x128xf32>
    %261 = arith.addf %242, %260 : vector<1x128xf32>
    %c61 = arith.constant 61 : index
    %262 = memref.load %arg1[%c61] : memref<76xf32, #tpu.memory_space<smem>>
    %263 = vector.broadcast %262 : f32 to vector<1x128xf32>
    %264 = arith.mulf %263, %257 : vector<1x128xf32>
    %265 = arith.addf %246, %264 : vector<1x128xf32>
    %c62 = arith.constant 62 : index
    %266 = memref.load %arg1[%c62] : memref<76xf32, #tpu.memory_space<smem>>
    %267 = vector.broadcast %266 : f32 to vector<1x128xf32>
    %268 = arith.mulf %267, %257 : vector<1x128xf32>
    %269 = arith.addf %250, %268 : vector<1x128xf32>
    %c63 = arith.constant 63 : index
    %270 = memref.load %arg1[%c63] : memref<76xf32, #tpu.memory_space<smem>>
    %271 = vector.broadcast %270 : f32 to vector<1x128xf32>
    %272 = arith.mulf %271, %257 : vector<1x128xf32>
    %273 = arith.addf %254, %272 : vector<1x128xf32>
    %274 = vector.extract_strided_slice %255 {offsets = [1, 0, 0], sizes = [1, 1, 128], strides = [1, 1, 1]} : vector<4x1x128xf32> to vector<1x1x128xf32>
    %275 = vector.shape_cast %274 : vector<1x1x128xf32> to vector<1x128xf32>
    %c64 = arith.constant 64 : index
    %276 = memref.load %arg1[%c64] : memref<76xf32, #tpu.memory_space<smem>>
    %277 = vector.broadcast %276 : f32 to vector<1x128xf32>
    %278 = arith.mulf %277, %275 : vector<1x128xf32>
    %279 = arith.addf %261, %278 : vector<1x128xf32>
    %c65 = arith.constant 65 : index
    %280 = memref.load %arg1[%c65] : memref<76xf32, #tpu.memory_space<smem>>
    %281 = vector.broadcast %280 : f32 to vector<1x128xf32>
    %282 = arith.mulf %281, %275 : vector<1x128xf32>
    %283 = arith.addf %265, %282 : vector<1x128xf32>
    %c66 = arith.constant 66 : index
    %284 = memref.load %arg1[%c66] : memref<76xf32, #tpu.memory_space<smem>>
    %285 = vector.broadcast %284 : f32 to vector<1x128xf32>
    %286 = arith.mulf %285, %275 : vector<1x128xf32>
    %287 = arith.addf %269, %286 : vector<1x128xf32>
    %c67 = arith.constant 67 : index
    %288 = memref.load %arg1[%c67] : memref<76xf32, #tpu.memory_space<smem>>
    %289 = vector.broadcast %288 : f32 to vector<1x128xf32>
    %290 = arith.mulf %289, %275 : vector<1x128xf32>
    %291 = arith.addf %273, %290 : vector<1x128xf32>
    %292 = vector.extract_strided_slice %255 {offsets = [2, 0, 0], sizes = [1, 1, 128], strides = [1, 1, 1]} : vector<4x1x128xf32> to vector<1x1x128xf32>
    %293 = vector.shape_cast %292 : vector<1x1x128xf32> to vector<1x128xf32>
    %c68 = arith.constant 68 : index
    %294 = memref.load %arg1[%c68] : memref<76xf32, #tpu.memory_space<smem>>
    %295 = vector.broadcast %294 : f32 to vector<1x128xf32>
    %296 = arith.mulf %295, %293 : vector<1x128xf32>
    %297 = arith.addf %279, %296 : vector<1x128xf32>
    %c69 = arith.constant 69 : index
    %298 = memref.load %arg1[%c69] : memref<76xf32, #tpu.memory_space<smem>>
    %299 = vector.broadcast %298 : f32 to vector<1x128xf32>
    %300 = arith.mulf %299, %293 : vector<1x128xf32>
    %301 = arith.addf %283, %300 : vector<1x128xf32>
    %c70 = arith.constant 70 : index
    %302 = memref.load %arg1[%c70] : memref<76xf32, #tpu.memory_space<smem>>
    %303 = vector.broadcast %302 : f32 to vector<1x128xf32>
    %304 = arith.mulf %303, %293 : vector<1x128xf32>
    %305 = arith.addf %287, %304 : vector<1x128xf32>
    %c71 = arith.constant 71 : index
    %306 = memref.load %arg1[%c71] : memref<76xf32, #tpu.memory_space<smem>>
    %307 = vector.broadcast %306 : f32 to vector<1x128xf32>
    %308 = arith.mulf %307, %293 : vector<1x128xf32>
    %309 = arith.addf %291, %308 : vector<1x128xf32>
    %310 = vector.extract_strided_slice %255 {offsets = [3, 0, 0], sizes = [1, 1, 128], strides = [1, 1, 1]} : vector<4x1x128xf32> to vector<1x1x128xf32>
    %311 = vector.shape_cast %310 : vector<1x1x128xf32> to vector<1x128xf32>
    %c72 = arith.constant 72 : index
    %312 = memref.load %arg1[%c72] : memref<76xf32, #tpu.memory_space<smem>>
    %313 = vector.broadcast %312 : f32 to vector<1x128xf32>
    %314 = arith.mulf %313, %311 : vector<1x128xf32>
    %315 = arith.addf %297, %314 : vector<1x128xf32>
    %c73 = arith.constant 73 : index
    %316 = memref.load %arg1[%c73] : memref<76xf32, #tpu.memory_space<smem>>
    %317 = vector.broadcast %316 : f32 to vector<1x128xf32>
    %318 = arith.mulf %317, %311 : vector<1x128xf32>
    %319 = arith.addf %301, %318 : vector<1x128xf32>
    %c74 = arith.constant 74 : index
    %320 = memref.load %arg1[%c74] : memref<76xf32, #tpu.memory_space<smem>>
    %321 = vector.broadcast %320 : f32 to vector<1x128xf32>
    %322 = arith.mulf %321, %311 : vector<1x128xf32>
    %323 = arith.addf %305, %322 : vector<1x128xf32>
    %c75 = arith.constant 75 : index
    %324 = memref.load %arg1[%c75] : memref<76xf32, #tpu.memory_space<smem>>
    %325 = vector.broadcast %324 : f32 to vector<1x128xf32>
    %326 = arith.mulf %325, %311 : vector<1x128xf32>
    %327 = arith.addf %309, %326 : vector<1x128xf32>
    %c0_3 = arith.constant 0 : index
    %c0_4 = arith.constant 0 : index
    %c0_5 = arith.constant 0 : index
    %328 = vector.load %arg3[%c0_3, %c0_4, %c0_5] : memref<4x1x128xf32, #tpu.memory_space<vmem>>, vector<1x1x128xf32>
    %329 = vector.shape_cast %328 : vector<1x1x128xf32> to vector<1x128xf32>
    %330 = vector.shape_cast %315 : vector<1x128xf32> to vector<1x1x128xf32>
    tpu.vector_store %arg3[%c0_3, %c0_4, %c0_5], %330 {strides = array<i32>} : memref<4x1x128xf32, #tpu.memory_space<vmem>>, vector<1x1x128xf32>,
    %c1_6 = arith.constant 1 : index
    %c0_7 = arith.constant 0 : index
    %c0_8 = arith.constant 0 : index
    %331 = vector.load %arg3[%c1_6, %c0_7, %c0_8] : memref<4x1x128xf32, #tpu.memory_space<vmem>>, vector<1x1x128xf32>
    %332 = vector.shape_cast %331 : vector<1x1x128xf32> to vector<1x128xf32>
    %333 = vector.shape_cast %319 : vector<1x128xf32> to vector<1x1x128xf32>
    tpu.vector_store %arg3[%c1_6, %c0_7, %c0_8], %333 {strides = array<i32>} : memref<4x1x128xf32, #tpu.memory_space<vmem>>, vector<1x1x128xf32>,
    %c2_9 = arith.constant 2 : index
    %c0_10 = arith.constant 0 : index
    %c0_11 = arith.constant 0 : index
    %334 = vector.load %arg3[%c2_9, %c0_10, %c0_11] : memref<4x1x128xf32, #tpu.memory_space<vmem>>, vector<1x1x128xf32>
    %335 = vector.shape_cast %334 : vector<1x1x128xf32> to vector<1x128xf32>
    %336 = vector.shape_cast %323 : vector<1x128xf32> to vector<1x1x128xf32>
    tpu.vector_store %arg3[%c2_9, %c0_10, %c0_11], %336 {strides = array<i32>} : memref<4x1x128xf32, #tpu.memory_space<vmem>>, vector<1x1x128xf32>,
    %c3_12 = arith.constant 3 : index
    %c0_13 = arith.constant 0 : index
    %c0_14 = arith.constant 0 : index
    %337 = vector.load %arg3[%c3_12, %c0_13, %c0_14] : memref<4x1x128xf32, #tpu.memory_space<vmem>>, vector<1x1x128xf32>
    %338 = vector.shape_cast %337 : vector<1x1x128xf32> to vector<1x128xf32>
    %339 = vector.shape_cast %327 : vector<1x128xf32> to vector<1x1x128xf32>
    tpu.vector_store %arg3[%c3_12, %c0_13, %c0_14], %339 {strides = array<i32>} : memref<4x1x128xf32, #tpu.memory_space<vmem>>, vector<1x1x128xf32>,
    return
  }
  func.func @transform_0(%arg0: i32) -> i32 {
    %c0_i32 = arith.constant 0 : i32
    %c0_i32_0 = arith.constant 0 : i32
    return %c0_i32 : i32
  }
  func.func @transform_1(%arg0: i32) -> (i32, i32, i32) {
    %c0_i32 = arith.constant 0 : i32
    %c0_i32_0 = arith.constant 0 : i32
    %c0_i32_1 = arith.constant 0 : i32
    return %c0_i32, %arg0, %c0_i32_0 : i32, i32, i32
  }
  func.func @transform_2(%arg0: i32) -> (i32, i32, i32) {
    %c0_i32 = arith.constant 0 : i32
    %c0_i32_0 = arith.constant 0 : i32
    %c0_i32_1 = arith.constant 0 : i32
    return %c0_i32, %arg0, %c0_i32_0 : i32, i32, i32
  }
}

</mosaic_0001>

<bundles_post_ra>
// kernel: sindy_forward.1
= control target key start
LH: loop header
LB: loop body
LE: loop exit
PB: predicated region body
PF: predicated region fallthrough
CT: control target
= control target key end

     0   :  { %7 = vsyncpa [#allocation3], 0  ;;  %s1686_s0 = inlined_call_operand.vmem [shape: f32[76], index: 0, kind: input, shape index: {}]   ;;  %s1687_s1 = inlined_call_operand.vmem [shape: f32[4,1,128], index: 1, kind: input, shape index: {}, may-alias: {1,2}]   ;;  %s1688_s2 = inlined_call_operand.vmem [shape: f32[4,1,128], index: 2, kind: output, shape index: {}, may-alias: {1,2}]  }
   0x1   :  { %s14_s11 = sshll.u32 %s1686_s0, 4  ;;  %s15_s11 = int_to_ptr.vmem [resolvable:$true] %s14_s11 }
   0x2   :  { %s903_s12 = scalar_lea.vmem %s15_s11, 16  ;;  %p908_p1 = scmp.lt.s32.totalorder %s15_s11, %s15_s11 }
   0x3   :  { %p904_p0 = scmp.ne.s32.totalorder %s15_s11, %s903_s12  ;;  %p909_p2 = scmp.lt.s32.totalorder %s903_s12, %s903_s12 }
   0x5   :  { %p910_p3 = por %p909_p2, %p908_p1 }
   0x7   :  { %p911_p4 = pnand %p910_p3, %p904_p0 }
   0x9   :  { %914 = shalt.err (!%p911_p4)
}
   0xa   :  { %s917_s13 = smov [#allocation2]  }
   0xb   :  { %17 = dma.vmem_to_smem %s15_s11, 16, %s917_s13, [#allocation3]  }
   0xc   :  { %915 = dma.done.wait [#allocation3], 16  }
   0xd   :  { %916 = vsyncadd [#allocation3], 4294967280 }
   0xe   :  { %23 = sfence }
   0xf   :  { %v945_v0 = vld [vmem:[%s1687_s1] sm:$0x1]  ;;  %s948_s0 = sld [smem:[#allocation2]]  ;;  %v971_v5 = vld [vmem:[%s1687_s1 + $0x1] sm:$0x1] }
  0x10   :  { %v277_v1 = vand.u32 2139095040, %v945_v0  ;;  %s950_s16 = sld [smem:[#allocation2 + $0x1]]  ;;  %v976_v6 = vld [vmem:[%s1687_s1 + $0x2] sm:$0x1]  ;;  %v983_v7 = vld [vmem:[%s1687_s1 + $0x3] sm:$0x1]  ;;  %v989_v8 = vmul.f32 %v945_v0, %v945_v0  ;;  %v993_v9 = vmul.f32 %v971_v5, %v945_v0  ;;  %v1006_v13 = vmul.f32 %v971_v5, %v971_v5 }
  0x11   :  { %s952_s17 = sld [smem:[#allocation2 + $0x2]]  ;;  %v274_v10 = vand.u32 2147483647, %v945_v0  ;;  %v998_v11 = vmul.f32 %v976_v6, %v945_v0  ;;  %v1002_v12 = vmul.f32 %v983_v7, %v945_v0  ;;  %v1022_v22 = vmul.f32 %v976_v6, %v971_v5 }
  0x12   :  { %v278_v2 = vshrl.u32 %v277_v1, 23  ;;  %s954_s18 = sld [smem:[#allocation2 + $0x3]]  ;;  %v381_v39 = vand.u32 2139095040, %v971_v5  ;;  %v378_v54 = vand.u32 2147483647, %v971_v5 }
  0x13   :  { %s956_s19 = sld [smem:[#allocation2 + $0x4]]  ;;  %v281_v23 = vand.u32 8388607, %v274_v10  ;;  %v918_v58 = vmov 683565275  }
  0x14   :  { %v825_v3 = vadd.s32 4294967169, %v278_v2  ;;  %s958_s20 = sld [smem:[#allocation2 + $0x5]]  ;;  %v382_v55 = vshrl.u32 %v381_v39, 23  ;;  %v919_v1 = vmov 2475754826  }
  0x15   :  { %s960_s21 = sld [smem:[#allocation2 + $0x6]]  ;;  %v29_v14 = vstv %s948_s0  ;;  %v282_v38 = vor.u32 8388608, %v281_v23  ;;  %v922_v23 = vmov 2131351028  }
  0x16   :  { %s962_s22 = sld [smem:[#allocation2 + $0x7]]  ;;  %v284_v4 = vadd.s32 1, %v825_v3  ;;  %v32_v15 = vstv %s950_s16  ;;  %v30_v25 = vadd.f32 %v29_v14, %v945_v0 }
  0x17   :  { %s964_s23 = sld [smem:[#allocation2 + $0x8]]  ;;  %v35_v16 = vstv %s952_s17  ;;  %v33_v26 = vadd.f32 %v32_v15, %v971_v5  ;;  %v1055_v51 = vshll.u32 %v282_v38, 8 }
  0x18   :  { %s966_s24 = sld [smem:[#allocation2 + $0x9]]  ;;  %vm285_vm0 = vcmp.gt.s32.totalorder %v284_v4, 0  ;;  %v38_v18 = vstv %s954_s18  ;;  %v36_v27 = vadd.f32 %v35_v16, %v976_v6 }
  0x19   :  { %s978_s29 = sld [smem:[#allocation2 + $0xa]]  ;;  %v41_v17 = vstv %s956_s19  ;;  %v286_v24 = vsel %vm285_vm0, %v284_v4, 0  ;;  %v39_v29 = vadd.f32 %v38_v18, %v983_v7 }
  0x1a   :  { %s985_s4 = sld [smem:[#allocation2 + $0xb]]  ;;  %v45_v19 = vstv %s958_s20  ;;  %v42_v28 = vmul.f32 %v41_v17, %v945_v0  ;;  %v288_v36 = vand.u32 31, %v286_v24  ;;  %v1059_v53 = vshrl.u32 %v286_v24, 5 }
  0x1b   :  { %v49_v20 = vstv %s960_s21  ;;  %s1015_s5 = sld [smem:[#allocation2 + $0xc]]  ;;  %v46_v30 = vmul.f32 %v45_v19, %v945_v0  ;;  %v920_v17 = vmov 920167782   ;;  %v921_v19 = vmov 1326507024  }
  0x1c   :  { %v53_v21 = vstv %s962_s22  ;;  %s1018_s6 = sld [smem:[#allocation2 + $0xd]]  ;;  %v50_v31 = vmul.f32 %v49_v20, %v945_v0  ;;  %v43_v40 = vadd.f32 %v42_v28, %v30_v25  ;;  %v289_v48 = vsub.s32 32, %v288_v36 }
  0x1d   :  { %v57_v32 = vstv %s964_s23  ;;  %s1034_s7 = sld [smem:[#allocation2 + $0xe]]  ;;  %v54_v33 = vmul.f32 %v53_v21, %v945_v0  ;;  %v47_v42 = vadd.f32 %v46_v30, %v33_v26  ;;  %v291_v60 = vshll.u32 %v918_v58, %v288_v36 }
  0x1e   :  { %v61_v34 = vstv %s966_s24  ;;  %s1039_s8 = sld [smem:[#allocation2 + $0xf]]  ;;  %v58_v41 = vmul.f32 %v57_v32, %v971_v5  ;;  %v51_v43 = vadd.f32 %v50_v31, %v36_v27  ;;  %v1063_v59 = vshrl.u32 %v918_v58, %v289_v48 }
  0x1f   :  { %v65_v35 = vstv %s978_s29  ;;  %s1042_s9 = sld [smem:[#allocation2 + $0x10]]  ;;  %v62_v44 = vmul.f32 %v61_v34, %v971_v5  ;;  %v55_v46 = vadd.f32 %v54_v33, %v39_v29  ;;  %v292_v2 = vshrl.u32 %v919_v1, %v289_v48 }
  0x20   :  { %v69_v37 = vstv %s985_s4  ;;  %s1046_s10 = sld [smem:[#allocation2 + $0x11]]  ;;  %v66_v45 = vmul.f32 %v65_v35, %v971_v5  ;;  %v59_v52 = vadd.f32 %v58_v41, %v43_v40  ;;  %v294_v15 = vshll.u32 %v919_v1, %v288_v36 }
  0x21   :  { %v70_v47 = vmul.f32 %v69_v37, %v971_v5  ;;  %v73_v49 = vstv %s1015_s5  ;;  %s1053_s11 = sld [smem:[#allocation2 + $0x12]]  ;;  %v63_v56 = vadd.f32 %v62_v44, %v47_v42  ;;  %v303_v18 = vshll.u32 %v920_v17, %v288_v36 }
  0x22   :  { %v77_v50 = vstv %s1018_s6  ;;  %s1057_s12 = sld [smem:[#allocation2 + $0x13]]  ;;  %v67_v57 = vadd.f32 %v66_v45, %v51_v43  ;;  %v74_v62 = vmul.f32 %v73_v49, %v976_v6  ;;  %v304_v20 = vshrl.u32 %v921_v19, %v289_v48 }
  0x23   :  { %v71_v61 = vadd.f32 %v70_v47, %v55_v46  ;;  %v78_v63 = vmul.f32 %v77_v50, %v976_v6  ;;  %s1068_s13 = sld [smem:[#allocation2 + $0x14]]  ;;  %v81_v3 = vstv %s1034_s7  ;;  %vm306_vm1 = vcmp.lt.s32.totalorder %v1059_v53, 1 }
  0x24   :  { %v85_v4 = vstv %s1039_s8  ;;  %s1076_s14 = sld [smem:[#allocation2 + $0x15]]  ;;  %v829_v21 = vadd.s32 4294967169, %v382_v55  ;;  %v297_v24 = vshll.u32 %v922_v23, %v288_v36  ;;  %v923_v25 = vmov 2102212464  }
  0x25   :  { %v89_v14 = vstv %s1042_s9  ;;  %v298_v26 = vshrl.u32 %v923_v25, %v289_v48  ;;  %v300_v27 = vshll.u32 %v923_v25, %v288_v36  ;;  %v301_v28 = vshrl.u32 %v920_v17, %v289_v48  ;;  %s1087_s15 = sld [smem:[#allocation2 + $0x16]] }
  0x26   :  { %v93_v16 = vstv %s1046_s10  ;;  %v75_v29 = vadd.f32 %v74_v62, %v59_v52  ;;  %v82_v30 = vmul.f32 %v81_v3, %v976_v6  ;;  %v86_v31 = vmul.f32 %v85_v4, %v976_v6  ;;  %s1096_s0 = sld [smem:[#allocation2 + $0x17]] }
  0x27   :  { %v388_v32 = vadd.s32 1, %v829_v21  ;;  %v79_v33 = vadd.f32 %v78_v63, %v63_v56  ;;  %v90_v34 = vmul.f32 %v89_v14, %v983_v7  ;;  %v94_v35 = vmul.f32 %v93_v16, %v983_v7  ;;  %s1099_s16 = sld [smem:[#allocation2 + $0x18]] }
  0x28   :  { %v295_v37 = vshrl.u32 %v922_v23, %v289_v48  ;;  %v97_v38 = vstv %s1053_s11  ;;  %v101_v36 = vstv %s1057_s12  ;;  %v305_v39 = vor.u32 %v304_v20, %v303_v18  ;;  %s1105_s17 = sld [smem:[#allocation2 + $0x19]] }
  0x29   :  { %vm389_vm2 = vcmp.gt.s32.totalorder %v388_v32, 0  ;;  %v299_v40 = vor.u32 %v298_v26, %v297_v24  ;;  %v302_v41 = vor.u32 %v301_v28, %v300_v27  ;;  %vm309_vm3 = vcmp.lt.s32.totalorder %v1059_v53, 4  ;;  %s1167_s18 = sld [smem:[#allocation2 + $0x1a]] }
  0x2a   :  { %v390_v42 = vsel %vm389_vm2, %v388_v32, 0  ;;  %v83_v43 = vadd.f32 %v82_v30, %v67_v57  ;;  %v87_v44 = vadd.f32 %v86_v31, %v71_v61  ;;  %v106_v45 = vstv %s1068_s13  ;;  %s1172_s19 = sld [smem:[#allocation2 + $0x1b]] }
  0x2b   :  { %v293_v46 = vor.u32 %v292_v2, %v291_v60  ;;  %v98_v47 = vmul.f32 %v97_v38, %v983_v7  ;;  %v296_v48 = vor.u32 %v295_v37, %v294_v15  ;;  %v311_v49 = vsel %vm309_vm3, %v299_v40, 2102212464  ;;  %s1176_s20 = sld [smem:[#allocation2 + $0x1c]] }
  0x2c   :  { %v392_v50 = vand.u32 31, %v390_v42  ;;  %v102_v52 = vmul.f32 %v101_v36, %v983_v7  ;;  %v110_v55 = vstv %s1076_s14  ;;  %vm308_vm4 = vcmp.lt.s32.totalorder %v1059_v53, 3  ;;  %s1181_s21 = sld [smem:[#allocation2 + $0x1d]] }
  0x2d   :  { %v319_v56 = vsel %vm309_vm3, %v305_v39, 1326507024  ;;  %v91_v57 = vadd.f32 %v90_v34, %v75_v29  ;;  %v95_v60 = vadd.f32 %v94_v35, %v79_v33  ;;  %v107_v61 = vmul.f32 %v106_v45, %v989_v8  ;;  %s1183_s22 = sld [smem:[#allocation2 + $0x1e]] }
  0x2e   :  { %v315_v62 = vsel %vm309_vm3, %v302_v41, 920167782  ;;  %v114_v63 = vstv %s1087_s15  ;;  %v310_v2 = vsel %vm306_vm1, %v1063_v59, %v293_v46  ;;  %v312_v3 = vsel %vm308_vm4, %v296_v48, %v311_v49  ;;  %s1189_s23 = sld [smem:[#allocation2 + $0x1f]] }
  0x2f   :  { %v393_v4 = vsub.s32 32, %v392_v50  ;;  %v111_v14 = vmul.f32 %v110_v55, %v989_v8  ;;  %vm307_vm5 = vcmp.lt.s32.totalorder %v1059_v53, 2  ;;  %v318_v15 = vsel %vm306_vm1, %v296_v48, %v299_v40  ;;  %s1194_s24 = sld [smem:[#allocation2 + $0x20]] }
  0x30   :  { %v320_v16 = vsel %vm308_vm4, %v302_v41, %v319_v56  ;;  %v1125_v18 = vadd.f32 %v98_v47, %v83_v43  ;;  %v1127_v20 = vadd.f32 %v102_v52, %v87_v44  ;;  %v314_v59 = vsel %vm306_vm1, %v293_v46, %v296_v48  ;;  %s1216_s25 = sld [smem:[#allocation2 + $0x21]] }
  0x31   :  { %v316_v21 = vsel %vm308_vm4, %v299_v40, %v315_v62  ;;  %v1133_v24 = vadd.f32 %v107_v61, %v91_v57  ;;  %v1136_v26 = vmul.f32 %v114_v63, %v989_v8  ;;  %v313_v27 = vsel %vm307_vm5, %v310_v2, %v312_v3  ;;  %s1223_s26 = sld [smem:[#allocation2 + $0x22]] }
  0x32   :  { %v385_v28 = vand.u32 8388607, %v378_v54  ;;  %v118_v29 = vstv %s1096_s0  ;;  %v321_v30 = vsel %vm307_vm5, %v318_v15, %v320_v16  ;;  %v395_v31 = vshll.u32 %v918_v58, %v392_v50  ;;  %s1238_s27 = sld [smem:[#allocation2 + $0x23]] }
  0x33   :  { %v396_v32 = vshrl.u32 %v919_v1, %v393_v4  ;;  %v1147_v33 = vadd.f32 %v111_v14, %v95_v60  ;;  %v317_v34 = vsel %vm307_vm5, %v314_v59, %v316_v21  ;;  %v398_v35 = vshll.u32 %v919_v1, %v392_v50  ;;  %s1270_s28 = sld [smem:[#allocation2 + $0x24]] }
  0x34   :  { %v399_v37 = vshrl.u32 %v922_v23, %v393_v4  ;;  %v123_v38 = vstv %s1099_s16  ;;  %v127_v36 = vstv %s1105_s17  ;;  %v329_v39 = vmul.u32 %v1055_v51, %v313_v27  ;;  %s1294_s29 = sld [smem:[#allocation2 + $0x25]] }
  0x35   :  { %v391_v40 = vshrl.u32 %v390_v42, 5  ;;  %v1157_v41 = vmul.u32.u64.low %v1055_v51, %v321_v30  ;;  %v1158_v43 = vmul.u32.u64.high %v1055_v51, %v321_v30, %v1157_v41  ;;  %v386_v44 = vor.u32 8388608, %v385_v28  ;;  %s1298_s30 = sld [smem:[#allocation2 + $0x26]] }
  0x36   :  { %v401_v45 = vshll.u32 %v922_v23, %v392_v50  ;;  %v1162_v46 = vmul.u32.u64.low %v1055_v51, %v317_v34  ;;  %v1163_v53 = vmul.u32.u64.high %v1055_v51, %v317_v34, %v1162_v46  ;;  %v394_v47 = vshrl.u32 %v918_v58, %v393_v4  ;;  %s1300_s3 = sld [smem:[#allocation2 + $0x27]] }
  0x37   :  { %v397_v48 = vor.u32 %v396_v32, %v395_v31  ;;  %v400_v49 = vor.u32 %v399_v37, %v398_v35  ;;  %v402_v42 = vshrl.u32 %v923_v25, %v393_v4  ;;  %v404_v52 = vshll.u32 %v923_v25, %v392_v50  ;;  %s1368_s4 = sld [smem:[#allocation2 + $0x28]] }
  0x38   :  { %v405_v55 = vshrl.u32 %v920_v17, %v393_v4  ;;  %v407_v56 = vshll.u32 %v920_v17, %v392_v50  ;;  %v408_v51 = vshrl.u32 %v921_v19, %v393_v4  ;;  %vm410_vm6 = vcmp.lt.s32.totalorder %v391_v40, 1  ;;  %s1375_s5 = sld [smem:[#allocation2 + $0x29]] }
  0x39   :  { %vm411_vm7 = vcmp.lt.s32.totalorder %v391_v40, 2  ;;  %vm331_vm8 = vc.u32 %v1158_v43, %v1162_v46  ;;  %v403_v57 = vor.u32 %v402_v42, %v401_v45  ;;  %vm412_vm9 = vcmp.lt.s32.totalorder %v391_v40, 3  ;;  %s1389_s6 = sld [smem:[#allocation2 + $0x2a]] }
  0x3a   :  { %v406_v60 = vor.u32 %v405_v55, %v404_v52  ;;  %v332_v61 = vadd.s32 1, %v1163_v53  ;;  %v409_v62 = vor.u32 %v408_v51, %v407_v56  ;;  %vm413_vm10 = vcmp.lt.s32.totalorder %v391_v40, 4  ;;  %s1399_s7 = sld [smem:[#allocation2 + $0x2b]] }
  0x3b   :  { %v414_v63 = vsel %vm410_vm6, %v394_v47, %v397_v48  ;;  %v415_v50 = vsel %vm413_vm10, %v403_v57, 2102212464  ;;  %v418_v2 = vsel %vm410_vm6, %v397_v48, %v400_v49  ;;  %v422_v4 = vsel %vm410_vm6, %v400_v49, %v403_v57  ;;  %s1422_s8 = sld [smem:[#allocation2 + $0x2c]] }
  0x3c   :  { %v419_v3 = vsel %vm413_vm10, %v406_v60, 920167782  ;;  %v333_v14 = vsel %vm331_vm8, %v332_v61, %v1163_v53  ;;  %v416_v15 = vsel %vm412_vm9, %v400_v49, %v415_v50  ;;  %v423_v59 = vsel %vm413_vm10, %v409_v62, 1326507024  ;;  %s1429_s9 = sld [smem:[#allocation2 + $0x2d]] }
  0x3d   :  { %v420_v16 = vsel %vm412_vm9, %v403_v57, %v419_v3  ;;  %v119_v21 = vmul.f32 %v118_v29, %v989_v8  ;;  %v334_v27 = vadd.s32 %v333_v14, %v329_v39  ;;  %v424_v30 = vsel %vm412_vm9, %v406_v60, %v423_v59  ;;  %s1437_s10 = sld [smem:[#allocation2 + $0x2e]] }
  0x3e   :  { %v421_v28 = vsel %vm411_vm7, %v418_v2, %v420_v16  ;;  %v124_v31 = vmul.f32 %v123_v38, %v993_v9  ;;  %v425_v32 = vsel %vm411_vm7, %v422_v4, %v424_v30  ;;  %v426_v34 = vshll.u32 %v386_v44, 8  ;;  %s1447_s11 = sld [smem:[#allocation2 + $0x2f]] }
  0x3f   :  { %v485_v35 = vand.u32 2139095040, %v976_v6  ;;  %v128_v8 = vmul.f32 %v127_v36, %v993_v9  ;;  %v131_v29 = vstv %s1167_s18  ;;  %v335_v37 = vadd.s32 536870912, %v334_v27  ;;  %s1460_s12 = sld [smem:[#allocation2 + $0x30]] }
  0x40   :  { %v417_v41 = vsel %vm411_vm7, %v414_v63, %v416_v15  ;;  %v1201_v39 = vmul.u32.u64.low %v426_v34, %v425_v32  ;;  %v1202_v45 = vmul.u32.u64.high %v426_v34, %v425_v32, %v1201_v39  ;;  %v135_v38 = vstv %s1172_s19  ;;  %s1465_s13 = sld [smem:[#allocation2 + $0x31]] }
  0x41   :  { %v1204_v53 = vmul.u32.u64.low %v426_v34, %v421_v28  ;;  %v1205_v47 = vmul.u32.u64.high %v426_v34, %v421_v28, %v1204_v53  ;;  %v140_v48 = vstv %s1176_s20  ;;  %v1210_v49 = vshrl.u32 %v335_v37, 30  ;;  %s1474_s14 = sld [smem:[#allocation2 + $0x32]] }
  0x42   :  { %v486_v44 = vshrl.u32 %v485_v35, 23  ;;  %v116_v36 = vadd.f32 %v1136_v26, %v1125_v18  ;;  %v120_v42 = vadd.f32 %v119_v21, %v1127_v20  ;;  %v125_v40 = vadd.f32 %v124_v31, %v1133_v24  ;;  %s1488_s15 = sld [smem:[#allocation2 + $0x33]] }
  0x43   :  { %v1220_v52 = vmul.f32 %v983_v7, %v971_v5  ;;  %v132_v55 = vmul.f32 %v131_v29, %v993_v9  ;;  %v337_v56 = vshll.u32 %v1210_v49, 30  ;;  %v433_v18 = vmul.u32 %v426_v34, %v417_v41  ;;  %s1491_s0 = sld [smem:[#allocation2 + $0x34]] }
  0x44   :  { %v833_v26 = vadd.s32 4294967169, %v486_v44  ;;  %v136_v20 = vmul.f32 %v135_v38, %v993_v9  ;;  %v141_v24 = vmul.f32 %v140_v48, %v998_v11  ;;  %vm435_vm11 = vc.u32 %v1202_v45, %v1204_v53  ;;  %s1501_s16 = sld [smem:[#allocation2 + $0x35]] }
  0x45   :  { %v436_v51 = vadd.s32 1, %v1205_v47  ;;  %v129_v57 = vadd.f32 %v128_v8, %v1147_v33  ;;  %v144_v60 = vstv %s1181_s21  ;;  %v1233_v61 = vsub.s32 %v334_v27, %v337_v56  ;;  %s1508_s17 = sld [smem:[#allocation2 + $0x36]] }
  0x46   :  { %v492_v62 = vadd.s32 1, %v833_v26  ;;  %v148_v63 = vstv %s1183_s22  ;;  %v152_v50 = vstv %s1189_s23  ;;  %v157_v2 = vstv %s1194_s24  ;;  %s1514_s18 = sld [smem:[#allocation2 + $0x37]] }
  0x47   :  { %v437_v9 = vsel %vm435_vm11, %v436_v51, %v1205_v47  ;;  %v133_v3 = vadd.f32 %v132_v55, %v116_v36  ;;  %v340_v4 = vsub.s32 0, %v1233_v61  ;;  %v137_v15 = vadd.f32 %v136_v20, %v120_v42  ;;  %s1522_s19 = sld [smem:[#allocation2 + $0x38]] }
  0x48   :  { %v438_v14 = vadd.s32 %v437_v9, %v433_v18  ;;  %vm493_vm12 = vcmp.gt.s32.totalorder %v492_v62, 0  ;;  %v142_v33 = vadd.f32 %v141_v24, %v125_v40  ;;  %v145_v16 = vmul.f32 %v144_v60, %v998_v11  ;;  %s1534_s20 = sld [smem:[#allocation2 + $0x39]] }
  0x49   :  { %v494_v59 = vsel %vm493_vm12, %v492_v62, 0  ;;  %v149_v21 = vmul.f32 %v148_v63, %v998_v11  ;;  %v153_v27 = vmul.f32 %v152_v50, %v998_v11  ;;  %v158_v28 = vmul.f32 %v157_v2, %v1002_v12  ;;  %s1553_s23 = sld [smem:[#allocation2 + $0x3a]] }
  0x4a   :  { %v439_v30 = vadd.s32 536870912, %v438_v14  ;;  %v161_v31 = vstv %s1216_s25  ;;  %v1249_v32 = vmul.f32 %v976_v6, %v976_v6  ;;  %v496_v34 = vand.u32 31, %v494_v59  ;;  %s1565_s24 = sld [smem:[#allocation2 + $0x3b]] }
  0x4b   :  { %v589_v35 = vand.u32 2139095040, %v983_v7  ;;  %v165_v8 = vstv %s1223_s26  ;;  %v1255_v29 = vmul.f32 %v983_v7, %v976_v6  ;;  %v1259_v11 = vmul.f32 %v983_v7, %v983_v7  ;;  %s1580_s25 = sld [smem:[#allocation2 + $0x3c]] }
  0x4c   :  { %v826_v37 = vmin.u32 %v340_v4, %v1233_v61  ;;  %v146_v41 = vadd.f32 %v145_v16, %v129_v57  ;;  %v1262_v39 = vshrl.u32 %v439_v30, 30  ;;  %v482_v47 = vand.u32 2147483647, %v976_v6  ;;  %s1582_s26 = sld [smem:[#allocation2 + $0x3d]] }
  0x4d   :  { %v497_v38 = vsub.s32 32, %v496_v34  ;;  %v150_v48 = vadd.f32 %v149_v21, %v133_v3  ;;  %v1265_v44 = vadd.f32 %v153_v27, %v137_v15  ;;  %v1267_v36 = vadd.f32 %v158_v28, %v142_v33 }
  0x4e   :  { %v162_v42 = vmul.f32 %v161_v31, %v1002_v12  ;;  %v166_v40 = vmul.f32 %v165_v8, %v1002_v12  ;;  %v169_v55 = vstv %s1238_s27  ;;  %v441_v56 = vshll.u32 %v1262_v39, 30 }
  0x4f   :  { %v590_v18 = vshrl.u32 %v589_v35, 23  ;;  %v342_v26 = vclz %v826_v37  ;;  %v499_v20 = vshll.u32 %v918_v58, %v496_v34  ;;  %v502_v24 = vshll.u32 %v919_v1, %v496_v34 }
  0x50   :  { %v508_v51 = vshll.u32 %v923_v25, %v496_v34  ;;  %v1278_v57 = vsub.s32 %v438_v14, %v441_v56  ;;  %v500_v60 = vshrl.u32 %v919_v1, %v497_v38  ;;  %v503_v62 = vshrl.u32 %v922_v23, %v497_v38 }
  0x51   :  { %v509_v63 = vshrl.u32 %v920_v17, %v497_v38  ;;  %v489_v50 = vand.u32 8388607, %v482_v47  ;;  %v495_v2 = vshrl.u32 %v494_v59, 5  ;;  %v505_v9 = vshll.u32 %v922_v23, %v496_v34 }
  0x52   :  { %v506_v3 = vshrl.u32 %v923_v25, %v497_v38  ;;  %v1287_v4 = vadd.f32 %v162_v42, %v146_v41  ;;  %v444_v14 = vsub.s32 0, %v1278_v57  ;;  %v511_v15 = vshll.u32 %v920_v17, %v496_v34 }
  0x53   :  { %v837_v33 = vadd.s32 4294967169, %v590_v18  ;;  %v170_v16 = vmul.f32 %v169_v55, %v1002_v12  ;;  %v827_v21 = vadd.s32 4294967294, %v342_v26  ;;  %v512_v27 = vshrl.u32 %v921_v19, %v497_v38 }
  0x54   :  { %v586_v28 = vand.u32 2147483647, %v983_v7  ;;  %v830_v59 = vmin.u32 %v444_v14, %v1278_v57  ;;  %v501_v30 = vor.u32 %v500_v60, %v499_v20  ;;  %v504_v31 = vor.u32 %v503_v62, %v502_v24 }
  0x55   :  { %v510_v35 = vor.u32 %v509_v63, %v508_v51  ;;  %v174_v8 = vstv %s1270_s28  ;;  %v490_v37 = vor.u32 8388608, %v489_v50  ;;  %v507_v41 = vor.u32 %v506_v3, %v505_v9 }
  0x56   :  { %vm514_vm13 = vcmp.lt.s32.totalorder %v495_v2, 1  ;;  %v446_v34 = vclz %v830_v59  ;;  %v513_v12 = vor.u32 %v512_v27, %v511_v15  ;;  %vm516_vm14 = vcmp.lt.s32.totalorder %v495_v2, 3 }
  0x57   :  { %v596_v42 = vadd.s32 1, %v837_v33  ;;  %vm828_vm15 = vcmp.lt.s32.totalorder %v827_v21, 0  ;;  %v498_v55 = vshrl.u32 %v918_v58, %v497_v38  ;;  %vm517_vm0 = vcmp.lt.s32.totalorder %v495_v2, 4 }
  0x58   :  { %v593_v56 = vand.u32 8388607, %v586_v28  ;;  %vm515_vm1 = vcmp.lt.s32.totalorder %v495_v2, 2  ;;  %v519_v18 = vsel %vm517_vm0, %v507_v41, 2102212464  ;;  %v522_v26 = vsel %vm514_vm13, %v501_v30, %v504_v31 }
  0x59   :  { %v523_v20 = vsel %vm517_vm0, %v510_v35, 920167782  ;;  %v1306_v24 = vadd.f32 %v166_v40, %v150_v48  ;;  %v526_v60 = vsel %vm514_vm13, %v504_v31, %v507_v41  ;;  %v530_v62 = vshll.u32 %v490_v37, 8 }
  0x5a   :  { %v524_v51 = vsel %vm516_vm14, %v507_v41, %v523_v20  ;;  %v1310_v63 = vsel %vm828_vm15, 0, %v827_v21  ;;  %v831_v38 = vadd.s32 4294967294, %v446_v34  ;;  %v527_v50 = vsel %vm517_vm0, %v513_v12, 1326507024 }
  0x5b   :  { %vm597_vm2 = vcmp.gt.s32.totalorder %v596_v42, 0  ;;  %v518_v9 = vsel %vm514_vm13, %v498_v55, %v501_v30  ;;  %v520_v3 = vsel %vm516_vm14, %v504_v31, %v519_v18  ;;  %v525_v14 = vsel %vm515_vm1, %v522_v26, %v524_v51 }
  0x5c   :  { %v528_v48 = vsel %vm516_vm14, %v510_v35, %v527_v50  ;;  %v1317_v40 = vmul.f32 %v174_v8, %v1006_v13  ;;  %v178_v15 = vstv %s1294_s29  ;;  %v594_v21 = vor.u32 8388608, %v593_v56  ;;  %s1589_s29 = sld [smem:[#allocation2 + $0x3e]] }
  0x5d   :  { %v529_v33 = vsel %vm515_vm1, %v526_v60, %v528_v48  ;;  %v350_v27 = vsub.s32 4294967266, %v1310_v63  ;;  %v598_v30 = vsel %vm597_vm2, %v596_v42, 0  ;;  %vm832_vm3 = vcmp.lt.s32.totalorder %v831_v38, 0 }
  0x5e   :  { %v1322_v59 = vmul.u32.u64.low %v530_v62, %v529_v33  ;;  %v1323_v37 = vmul.u32.u64.high %v530_v62, %v529_v33, %v1322_v59  ;;  %v521_v31 = vsel %vm515_vm1, %v518_v9, %v520_v3  ;;  %v1331_v35 = vadd.f32 %v170_v16, %v1265_v44 }
  0x5f   :  { %v1326_v41 = vmul.u32.u64.low %v530_v62, %v525_v14  ;;  %v1327_v34 = vmul.u32.u64.high %v530_v62, %v525_v14, %v1326_v41  ;;  %v1334_v8 = vmul.f32 %v178_v15, %v1006_v13  ;;  %v182_v12 = vstv %s1298_s30  ;;  %s1595_s30 = sld [smem:[#allocation2 + $0x3f]] }
  0x60   :  { %v600_v55 = vand.u32 31, %v598_v30  ;;  %v186_v56 = vstv %s1300_s3  ;;  %v330_v18 = vadd.s32 %v1162_v46, %v1158_v43  ;;  %v346_v42 = vsub.s32 32, %v1310_v63 }
  0x61   :  { %v434_v2 = vadd.s32 %v1204_v53, %v1202_v45  ;;  %v1343_v26 = vsel %vm832_vm3, 0, %v831_v38  ;;  %v537_v20 = vmul.u32 %v530_v62, %v521_v31  ;;  %vm539_vm4 = vc.u32 %v1323_v37, %v1326_v41 }
  0x62   :  { %v601_v44 = vsub.s32 32, %v600_v55  ;;  %v347_v16 = vshll.u32 %v1233_v61, %v1310_v63  ;;  %v351_v51 = vadd.s32 127, %v350_v27  ;;  %v540_v60 = vadd.s32 1, %v1327_v34 }
  0x63   :  { %v1350_v50 = vshll.u32 %v594_v21, 8  ;;  %v1352_v43 = vshrl.u32 %v598_v30, 5  ;;  %v603_v46 = vshll.u32 %v918_v58, %v600_v55  ;;  %v606_v53 = vshll.u32 %v919_v1, %v600_v55 }
  0x64   :  { %v604_v45 = vshrl.u32 %v919_v1, %v601_v44  ;;  %v454_v62 = vsub.s32 4294967266, %v1343_v26  ;;  %v541_v38 = vsel %vm539_vm4, %v540_v60, %v1327_v34  ;;  %v607_v9 = vshrl.u32 %v922_v23, %v601_v44 }
  0x65   :  { %v609_v61 = vshll.u32 %v922_v23, %v600_v55  ;;  %v348_v63 = vshrl.u32 %v330_v18, %v346_v42  ;;  %v542_v3 = vadd.s32 %v541_v38, %v537_v20  ;;  %v610_v14 = vshrl.u32 %v923_v25, %v601_v44 }
  0x66   :  { %v612_v48 = vshll.u32 %v923_v25, %v600_v55  ;;  %v605_v15 = vor.u32 %v604_v45, %v603_v46  ;;  %v608_v33 = vor.u32 %v607_v9, %v606_v53  ;;  %v613_v21 = vshrl.u32 %v920_v17, %v601_v44 }
  0x67   :  { %v615_v1 = vshll.u32 %v920_v17, %v600_v55  ;;  %v352_v27 = vshll.u32 %v351_v51, 23  ;;  %v543_v59 = vadd.s32 536870912, %v542_v3  ;;  %v616_v30 = vshrl.u32 %v921_v19, %v601_v44 }
  0x68   :  { %vm618_vm5 = vcmp.lt.s32.totalorder %v1352_v43, 1  ;;  %v450_v23 = vsub.s32 32, %v1343_v26  ;;  %v455_v31 = vadd.s32 127, %v454_v62  ;;  %v611_v34 = vor.u32 %v610_v14, %v609_v61 }
  0x69   :  { %v614_v18 = vor.u32 %v613_v21, %v612_v48  ;;  %v1370_v25 = vshrl.u32 %v543_v59, 30  ;;  %v602_v42 = vshrl.u32 %v918_v58, %v601_v44  ;;  %vm620_vm6 = vcmp.lt.s32.totalorder %v1352_v43, 3 }
  0x6a   :  { %vm621_vm7 = vcmp.lt.s32.totalorder %v1352_v43, 4  ;;  %v617_v17 = vor.u32 %v616_v30, %v615_v1  ;;  %vm619_vm8 = vcmp.lt.s32.totalorder %v1352_v43, 2  ;;  %v626_v19 = vsel %vm618_vm5, %v605_v15, %v608_v33 }
  0x6b   :  { %v627_v55 = vsel %vm621_vm7, %v614_v18, 920167782  ;;  %v349_v20 = vor.u32 %v348_v63, %v347_v16  ;;  %v353_v51 = vor.u32 4788187, %v352_v27  ;;  %v545_v60 = vshll.u32 %v1370_v25, 30 }
  0x6c   :  { %v623_v58 = vsel %vm621_vm7, %v611_v34, 2102212464  ;;  %v451_v44 = vshll.u32 %v1278_v57, %v1343_v26  ;;  %v452_v46 = vshrl.u32 %v434_v2, %v450_v23  ;;  %v456_v45 = vshll.u32 %v455_v31, 23 }
  0x6d   :  { %v628_v53 = vsel %vm620_vm6, %v611_v34, %v627_v55  ;;  %v1391_v62 = vsub.s32 %v542_v3, %v545_v60  ;;  %v622_v16 = vsel %vm618_vm5, %v602_v42, %v605_v15  ;;  %v630_v57 = vsel %vm618_vm5, %v608_v33, %v611_v34 }
  0x6e   :  { %v629_v38 = vsel %vm619_vm8, %v626_v19, %v628_v53  ;;  %v624_v2 = vsel %vm620_vm6, %v608_v33, %v623_v58  ;;  %v631_v26 = vsel %vm621_vm7, %v617_v17, 1326507024  ;;  %v354_v63 = vand.u32 2147483647, %v353_v51 }
  0x6f   :  { %v1406_v9 = vmul.u32.u64.low %v1350_v50, %v629_v38  ;;  %v1407_v61 = vmul.u32.u64.high %v1350_v50, %v629_v38, %v1406_v9  ;;  %v356_v3 = vcvt.s32.f32 %v349_v20  ;;  %v548_v14 = vsub.s32 0, %v1391_v62 }
  0x70   :  { %v632_v48 = vsel %vm620_vm6, %v614_v18, %v631_v26  ;;  %v183_v15 = vmul.f32 %v182_v12, %v1006_v13  ;;  %v453_v33 = vor.u32 %v452_v46, %v451_v44  ;;  %v457_v21 = vor.u32 4788187, %v456_v45 }
  0x71   :  { %v633_v1 = vsel %vm619_vm8, %v630_v57, %v632_v48  ;;  %v187_v27 = vmul.f32 %v186_v56, %v1006_v13  ;;  %v191_v59 = vstv %s1368_s4  ;;  %v834_v30 = vmin.u32 %v548_v14, %v1391_v62 }
  0x72   :  { %v625_v23 = vsel %vm619_vm8, %v622_v16, %v624_v2  ;;  %v176_v31 = vadd.f32 %v1317_v40, %v1267_v36  ;;  %vm276_vm9 = vcmp.lt.s32.totalorder %v945_v0, 0  ;;  %v195_v13 = vstv %s1375_s5  ;;  %s1600_s5 = sld [smem:[#allocation2 + $0x40]] }
  0x73   :  { %v1433_v12 = vmul.u32.u64.low %v1350_v50, %v633_v1  ;;  %v1434_v34 = vmul.u32.u64.high %v1350_v50, %v633_v1, %v1433_v12  ;;  %vm1441_vm10 = vcmp.le.f32.partialorder %v274_v10, 0.7853982  ;;  %v357_v36 = vmul.f32 %v356_v3, %v354_v63 }
  0x74   :  { %v550_v40 = vclz %v834_v30  ;;  %v644_v43 = vadd.s32 1, %v1407_v61  ;;  %v192_v18 = vmul.f32 %v191_v59, %v1022_v22  ;;  %v458_v42 = vand.u32 2147483647, %v457_v21 }
  0x75   :  { %v460_v17 = vcvt.s32.f32 %v453_v33  ;;  %v641_v19 = vmul.u32 %v1350_v50, %v625_v23  ;;  %v180_v55 = vadd.f32 %v1334_v8, %v1287_v4  ;;  %v184_v10 = vadd.f32 %v183_v15, %v1306_v24 }
  0x76   :  { %v188_v20 = vadd.f32 %v187_v27, %v1331_v35  ;;  %vm380_vm11 = vcmp.lt.s32.totalorder %v971_v5, 0  ;;  %v835_v51 = vadd.s32 4294967294, %v550_v40  ;;  %v196_v60 = vmul.f32 %v195_v13, %v1022_v22 }
  0x77   :  { %v199_v58 = vstv %s1389_s6  ;;  %v203_v44 = vstv %s1399_s7  ;;  %vm643_vm12 = vc.u32 %v1434_v34, %v1406_v9  ;;  %v358_v50 = vxor.u32 2147483648, %v357_v36 }
  0x78   :  { %v538_v4 = vadd.s32 %v1326_v41, %v1323_v37  ;;  %vm836_vm13 = vcmp.lt.s32.totalorder %v835_v51, 0  ;;  %v645_v24 = vsel %vm643_vm12, %v644_v43, %v1407_v61  ;;  %v193_v35 = vadd.f32 %v192_v18, %v176_v31 }
  0x79   :  { %vm1469_vm14 = vcmp.le.f32.partialorder %v378_v54, 0.7853982  ;;  %v461_v46 = vmul.f32 %v460_v17, %v458_v42  ;;  %v553_v45 = vsel %vm836_vm13, 0, %v835_v51  ;;  %v646_v53 = vadd.s32 %v645_v24, %v641_v19 }
  0x7a   :  { %v200_v37 = vmul.f32 %v199_v58, %v1022_v22  ;;  %v554_v41 = vsub.s32 32, %v553_v45  ;;  %v555_v16 = vshll.u32 %v1391_v62, %v553_v45  ;;  %v558_v38 = vsub.s32 4294967266, %v553_v45 }
  0x7b   :  { %v197_v57 = vadd.f32 %v196_v60, %v180_v55  ;;  %v204_v2 = vmul.f32 %v203_v44, %v1022_v22  ;;  %v208_v54 = vstv %s1422_s8  ;;  %v647_v26 = vadd.s32 536870912, %v646_v53  ;;  %s1609_s8 = sld [smem:[#allocation2 + $0x41]] }
  0x7c   :  { %v212_v61 = vstv %s1429_s9  ;;  %v359_v63 = vsel %vm276_vm9, %v358_v50, %v357_v36  ;;  %v556_v3 = vshrl.u32 %v538_v4, %v554_v41  ;;  %v559_v14 = vadd.s32 127, %v558_v38  ;;  %s1625_s9 = sld [smem:[#allocation2 + $0x43]] }
  0x7d   :  { %v216_v48 = vstv %s1437_s10  ;;  %v220_v15 = vstv %s1447_s11  ;;  %v462_v33 = vxor.u32 2147483648, %v461_v46  ;;  %vm484_vm15 = vcmp.lt.s32.totalorder %v976_v6, 0  ;;  %s1634_s10 = sld [smem:[#allocation2 + $0x44]] }
  0x7e   :  { %v1485_v21 = vshrl.u32 %v647_v26, 30  ;;  %v201_v62 = vadd.f32 %v200_v37, %v184_v10  ;;  %v209_v22 = vmul.f32 %v208_v54, %v1220_v52  ;;  %v557_v1 = vor.u32 %v556_v3, %v555_v16  ;;  %v1545_v26 = vld [vmem:[%s1687_s1 + $0x2] sm:$0x1]  ;;  %s1637_s11 = sld [smem:[#allocation2 + $0x45]] }
  0x7f   :  { %v560_v27 = vshll.u32 %v559_v14, 23  ;;  %v205_v59 = vadd.f32 %v204_v2, %v188_v20  ;;  %v213_v30 = vmul.f32 %v212_v61, %v1220_v52  ;;  %v362_v23 = vsel %vm1441_vm10, %v945_v0, %v359_v63 }
  0x80   :  { %v649_v31 = vshll.u32 %v1485_v21, 30  ;;  %v217_v12 = vmul.f32 %v216_v48, %v1220_v52  ;;  %v221_v13 = vmul.f32 %v220_v15, %v1220_v52  ;;  %v564_v40 = vcvt.s32.f32 %v557_v1 }
  0x81   :  { %v561_v36 = vor.u32 4788187, %v560_v27  ;;  %v225_v43 = vstv %s1460_s12  ;;  %v229_v18 = vstv %s1465_s13  ;;  %v463_v42 = vsel %vm380_vm11, %v462_v33, %v461_v46  ;;  %s1643_s12 = sld [smem:[#allocation2 + $0x46]] }
  0x82   :  { %v1505_v17 = vsub.s32 %v646_v53, %v649_v31  ;;  %v233_v19 = vstv %s1474_s14  ;;  %v360_v55 = vsub.s32 4, %v1210_v49  ;;  %883 = vcosq.f32 %v362_v23  ;;  %s1647_s13 = sld [smem:[#allocation2 + $0x47]] }
  0x83   :  { %v562_v10 = vand.u32 2147483647, %v561_v36  ;;  %v210_v52 = vadd.f32 %v209_v22, %v193_v35  ;;  %v214_v20 = vadd.f32 %v213_v30, %v197_v57  ;;  %885 = vsinq.f32 %v362_v23  ;;  %s1654_s14 = sld [smem:[#allocation2 + $0x48]] }
  0x84   :  { %v652_v51 = vsub.s32 0, %v1505_v17  ;;  %v226_v60 = vmul.f32 %v225_v43, %v1249_v32  ;;  %v230_v58 = vmul.f32 %v229_v18, %v1249_v32  ;;  %v466_v44 = vsel %vm1469_vm14, %v971_v5, %v463_v42 }
  0x85   :  { %v565_v50 = vmul.f32 %v564_v40, %v562_v10  ;;  %v218_v4 = vadd.f32 %v217_v12, %v201_v62  ;;  %v222_v24 = vadd.f32 %v221_v13, %v205_v59  ;;  %v234_v35 = vmul.f32 %v233_v19, %v1249_v32 }
  0x86   :  { %v838_v46 = vmin.u32 %v652_v51, %v1505_v17  ;;  %v237_v45 = vstv %s1488_s15  ;;  %v361_v53 = vsel %vm276_vm9, %v360_v55, %v1210_v49  ;;  %vm1529_vm0 = vcmp.le.f32.partialorder %v482_v47, 0.7853982  ;;  %s1659_s15 = sld [smem:[#allocation2 + $0x49]] }
  0x87   :  { %v566_v41 = vxor.u32 2147483648, %v565_v50  ;;  %v242_v16 = vstv %s1491_s0  ;;  %v464_v38 = vsub.s32 4, %v1262_v39  ;;  %887 = vcosq.f32 %v466_v44  ;;  %s1661_s0 = sld [smem:[#allocation2 + $0x4a]] }
  0x88   :  { %v654_v57 = vclz %v838_v46  ;;  %v227_v2 = vadd.f32 %v226_v60, %v210_v52  ;;  %v231_v54 = vadd.f32 %v230_v58, %v214_v20  ;;  %889 = vsinq.f32 %v466_v44 }
  0x89   :  { %v567_v0 = vsel %vm484_vm15, %v566_v41, %v565_v50  ;;  %v238_v49 = vmul.f32 %v237_v45, %v1249_v32  ;;  %v363_v47 = vsel %vm1441_vm10, 0, %v361_v53  ;;  %v235_v3 = vadd.f32 %v234_v35, %v218_v4  ;;  %v900_v4 = vld [vmem:[%s1687_s1] sm:$0x1] }
  0x8a   :  { %v570_v61 = vsel %vm1529_vm0, %v1545_v26, %v567_v0  ;;  %v839_v63 = vadd.s32 4294967294, %v654_v57  ;;  %v243_v14 = vmul.f32 %v242_v16, %v1255_v29  ;;  %v246_v48 = vstv %s1501_s16  ;;  %s1663_s16 = sld [smem:[#allocation2 + $0x4b]] }
  0x8b   :  { %v250_v15 = vstv %s1508_s17  ;;  %v465_v32 = vsel %vm380_vm11, %v464_v38, %v1262_v39  ;;  %v568_v56 = vsub.s32 4, %v1370_v25  ;;  %v642_v33 = vadd.s32 %v1406_v9, %v1434_v34 }
  0x8c   :  { %vm840_vm1 = vcmp.lt.s32.totalorder %v839_v63, 0  ;;  %v254_v62 = vstv %s1514_s18  ;;  %v367_v22 = vadd.s32 3, %v363_v47  ;;  %891 = vcosq.f32 %v570_v61 }
  0x8d   :  { %v657_v1 = vsel %vm840_vm1, 0, %v839_v63  ;;  %893 = vsinq.f32 %v570_v61  ;;  %v239_v23 = vadd.f32 %v238_v49, %v222_v24  ;;  %v247_v5 = vmul.f32 %v246_v48, %v1255_v29  ;;  %v1605_v61 = vld [vmem:[%s1687_s1 + $0x3] sm:$0x1] }
  0x8e   :  { %v658_v27 = vsub.s32 32, %v657_v1  ;;  %v659_v59 = vshll.u32 %v1505_v17, %v657_v1  ;;  %v662_v30 = vsub.s32 4294967266, %v657_v1  ;;  %v259_v39 = vstv %s1522_s19 }
  0x8f   :  { %v467_v9 = vsel %vm1469_vm14, 0, %v465_v32  ;;  %v884_v34 = vpop.eup %883  ;;  %v263_v31 = vstv %s1534_s20  ;;  %v569_v12 = vsel %vm484_vm15, %v568_v56, %v1370_v25  ;;  %v244_v43 = vadd.f32 %v243_v14, %v227_v2 }
  0x90   :  { %v660_v13 = vshrl.u32 %v642_v33, %v658_v27  ;;  %v663_v36 = vadd.s32 127, %v662_v30  ;;  %v886_v40 = vpop.eup %885  ;;  %v251_v18 = vmul.f32 %v250_v15, %v1255_v29  ;;  %v255_v42 = vmul.f32 %v254_v62, %v1255_v29 }
  0x91   :  { %v368_v17 = vand.u32 3, %v367_v22  ;;  %v260_v19 = vmul.f32 %v259_v39, %v1259_v11  ;;  %v471_v8 = vadd.s32 3, %v467_v9  ;;  %v248_v52 = vadd.f32 %v247_v5, %v231_v54  ;;  %v901_v54 = vld [vmem:[%s1687_s1 + $0x1] sm:$0x1]  ;;  %s1619_s1 = sld [smem:[#allocation2 + $0x42]] }
  0x92   :  { %v661_v55 = vor.u32 %v660_v13, %v659_v59  ;;  %v664_v10 = vshll.u32 %v663_v36, 23  ;;  %v264_v20 = vmul.f32 %v263_v31, %v1259_v11  ;;  %v267_v51 = vstv %s1553_s23 }
  0x93   :  { %v571_v6 = vsel %vm1529_vm0, 0, %v569_v12  ;;  %v371_v25 = vxor.u32 2147483648, %v886_v40  ;;  %v374_v60 = vxor.u32 2147483648, %v884_v34  ;;  %v252_v50 = vadd.f32 %v251_v18, %v235_v3 }
  0x94   :  { %v665_v58 = vor.u32 4788187, %v664_v10  ;;  %v668_v44 = vcvt.s32.f32 %v661_v55  ;;  %v888_v29 = vpop.eup %887  ;;  %vm366_vm2 = vweird.f32 %v900_v4  ;;  %vm370_vm3 = vcmp.eq.s32.totalorder %v368_v17, 0 }
  0x95   :  { %vm373_vm4 = vcmp.eq.s32.totalorder %v368_v17, 2  ;;  %v890_v24 = vpop.eup %889  ;;  %v256_v35 = vadd.f32 %v255_v42, %v239_v23  ;;  %v1587_v46 = vadd.f32 %v260_v19, %v244_v43  ;;  %v472_v45 = vand.u32 3, %v471_v8 }
  0x96   :  { %v666_v53 = vand.u32 2147483647, %v665_v58  ;;  %v1591_v37 = vadd.f32 %v264_v20, %v248_v52  ;;  %v268_v41 = vmul.f32 %v267_v51, %v1259_v11  ;;  %v271_v16 = vstv %s1565_s24 }
  0x97   :  { %v575_v38 = vadd.s32 3, %v571_v6  ;;  %vm369_vm5 = vcmp.lt.s32.totalorder %v368_v17, 2  ;;  %v372_v57 = vsel %vm370_vm3, %v884_v34, %v371_v25  ;;  %v375_v2 = vsel %vm373_vm4, %v374_v60, %v886_v40 }
  0x98   :  { %vm470_vm6 = vweird.f32 %v901_v54  ;;  %v669_v0 = vmul.f32 %v668_v44, %v666_v53  ;;  %v475_v49 = vxor.u32 2147483648, %v890_v24  ;;  %v478_v47 = vxor.u32 2147483648, %v888_v29 }
  0x99   :  { %vm588_vm7 = vcmp.lt.s32.totalorder %v1605_v61, 0  ;;  %v672_v63 = vsub.s32 4, %v1485_v21  ;;  %v892_v3 = vpop.eup %891  ;;  %vm474_vm8 = vcmp.eq.s32.totalorder %v472_v45, 0  ;;  %vm477_vm9 = vcmp.eq.s32.totalorder %v472_v45, 2 }
  0x9a   :  { %vm1613_vm10 = vcmp.le.f32.partialorder %v586_v28, 0.7853982  ;;  %v670_v48 = vxor.u32 2147483648, %v669_v0  ;;  %v894_v15 = vpop.eup %893  ;;  %v269_v32 = vadd.f32 %v268_v41, %v252_v50  ;;  %v272_v56 = vmul.f32 %v271_v16, %v1259_v11 }
  0x9b   :  { %v376_v33 = vsel %vm369_vm5, %v372_v57, %v375_v2  ;;  %v576_v62 = vand.u32 3, %v575_v38  ;;  %vm473_vm11 = vcmp.lt.s32.totalorder %v472_v45, 2  ;;  %v691_v7 = vstv %s1580_s25 }
  0x9c   :  { %v671_v22 = vsel %vm588_vm7, %v670_v48, %v669_v0  ;;  %v695_v28 = vstv %s1582_s26  ;;  %v476_v1 = vsel %vm474_vm8, %v888_v29, %v475_v49  ;;  %v479_v27 = vsel %vm477_vm9, %v478_v47, %v890_v24 }
  0x9d   :  { %v673_v11 = vsel %vm588_vm7, %v672_v63, %v1485_v21  ;;  %v674_v59 = vsel %vm1613_vm10, %v1605_v61, %v671_v22  ;;  %v377_v30 = vsel %vm366_vm2, nan, %v376_v33  ;;  %v579_v23 = vxor.u32 2147483648, %v894_v15 }
  0x9e   :  { %v582_v5 = vxor.u32 2147483648, %v892_v3  ;;  %895 = vcosq.f32 %v674_v59  ;;  %vm578_vm12 = vcmp.eq.s32.totalorder %v576_v62, 0  ;;  %vm581_vm13 = vcmp.eq.s32.totalorder %v576_v62, 2 }
  0x9f   :  { %897 = vsinq.f32 %v674_v59  ;;  %v699_v39 = vstv %s1589_s29  ;;  %v273_v21 = vadd.f32 %v272_v56, %v256_v35  ;;  %v480_v9 = vsel %vm473_vm11, %v476_v1, %v479_v27 }
  0xa0   :  { %v675_v34 = vsel %vm1613_vm10, 0, %v673_v11  ;;  %v703_v31 = vstv %s1595_s30  ;;  %v692_v12 = vmul.f32 %v691_v7, %v377_v30  ;;  %v696_v13 = vmul.f32 %v695_v28, %v377_v30 }
  0xa1   :  { %v707_v36 = vstv %s1600_s5  ;;  %v711_v40 = vstv %s1609_s8  ;;  %vm577_vm14 = vcmp.lt.s32.totalorder %v576_v62, 2  ;;  %v580_v43 = vsel %vm578_vm12, %v892_v3, %v579_v23 }
  0xa2   :  { %v583_v18 = vsel %vm581_vm13, %v582_v5, %v894_v15  ;;  %v700_v42 = vmul.f32 %v699_v39, %v377_v30  ;;  %v481_v17 = vsel %vm470_vm6, nan, %v480_v9  ;;  %v679_v19 = vadd.s32 3, %v675_v34 }
  0xa3   :  { %v704_v8 = vmul.f32 %v703_v31, %v377_v30  ;;  %v715_v55 = vstv %s1619_s1  ;;  %v719_v10 = vstv %s1625_s9  ;;  %vm574_vm15 = vweird.f32 %v1545_v26 }
  0xa4   :  { %v584_v52 = vsel %vm577_vm14, %v580_v43, %v583_v18  ;;  %v693_v20 = vadd.f32 %v692_v12, %v1587_v46  ;;  %v697_v51 = vadd.f32 %v696_v13, %v1591_v37  ;;  %v701_v6 = vadd.f32 %v700_v42, %v269_v32 }
  0xa5   :  { %v708_v25 = vmul.f32 %v707_v36, %v481_v17  ;;  %v712_v60 = vmul.f32 %v711_v40, %v481_v17  ;;  %v716_v58 = vmul.f32 %v715_v55, %v481_v17  ;;  %v680_v44 = vand.u32 3, %v679_v19 }
  0xa6   :  { %v705_v29 = vadd.f32 %v704_v8, %v273_v21  ;;  %v720_v50 = vmul.f32 %v719_v10, %v481_v17  ;;  %v585_v26 = vsel %vm574_vm15, nan, %v584_v52  ;;  %v723_v4 = vstv %s1634_s10 }
  0xa7   :  { %v727_v24 = vstv %s1637_s11  ;;  %v731_v35 = vstv %s1643_s12  ;;  %v735_v46 = vstv %s1647_s13  ;;  %v709_v45 = vadd.f32 %v708_v25, %v693_v20 }
  0xa8   :  { %v713_v53 = vadd.f32 %v712_v60, %v697_v51  ;;  %v717_v37 = vadd.f32 %v716_v58, %v701_v6  ;;  %vm682_vm0 = vcmp.eq.s32.totalorder %v680_v44, 0  ;;  %vm685_vm1 = vcmp.eq.s32.totalorder %v680_v44, 2 }
  0xa9   :  { %v721_v16 = vadd.f32 %v720_v50, %v705_v29  ;;  %v724_v38 = vmul.f32 %v723_v4, %v585_v26  ;;  %v728_v54 = vmul.f32 %v727_v24, %v585_v26  ;;  %v732_v0 = vmul.f32 %v731_v35, %v585_v26 }
  0xaa   :  { %v736_v49 = vmul.f32 %v735_v46, %v585_v26  ;;  %vm681_vm2 = vcmp.lt.s32.totalorder %v680_v44, 2  ;;  %vm678_vm3 = vweird.f32 %v1605_v61  ;;  %v739_v3 = vstv %s1654_s14 }
  0xab   :  { %v896_v41 = vpop.eup %895  ;;  %v743_v14 = vstv %s1659_s15  ;;  %v725_v15 = vadd.f32 %v724_v38, %v709_v45  ;;  %v747_v32 = vstv %s1661_s0  ;;  %v751_v56 = vstv %s1663_s16 }
  0xac   :  { %v898_v57 = vpop.eup %897  ;;  %v686_v2 = vxor.u32 2147483648, %v896_v41  ;;  %v729_v62 = vadd.f32 %v728_v54, %v713_v53  ;;  %v733_v22 = vadd.f32 %v732_v0, %v717_v37  ;;  %v737_v7 = vadd.f32 %v736_v49, %v721_v16 }
  0xad   :  { %v683_v47 = vxor.u32 2147483648, %v898_v57 }
  0xae   :  { %v687_v63 = vsel %vm685_vm1, %v686_v2, %v898_v57 }
  0xaf   :  { %v684_v48 = vsel %vm682_vm0, %v896_v41, %v683_v47 }
  0xb0   :  { %v688_v33 = vsel %vm681_vm2, %v684_v48, %v687_v63 }
  0xb1   :  { %v689_v28 = vsel %vm678_vm3, nan, %v688_v33 }
  0xb2   :  { %v740_v1 = vmul.f32 %v739_v3, %v689_v28  ;;  %v744_v27 = vmul.f32 %v743_v14, %v689_v28  ;;  %v748_v11 = vmul.f32 %v747_v32, %v689_v28  ;;  %v752_v59 = vmul.f32 %v751_v56, %v689_v28 }
  0xb4   :  { %v741_v30 = vadd.f32 %v740_v1, %v725_v15  ;;  %v745_v23 = vadd.f32 %v744_v27, %v729_v62  ;;  %v749_v5 = vadd.f32 %v748_v11, %v733_v22  ;;  %v753_v61 = vadd.f32 %v752_v59, %v737_v7 }
  0xb6   :  { %754 = vst [vmem:[%s1688_s2] sm:$0x1] %v741_v30  ;;  %857 = vst [vmem:[%s1688_s2 + $0x1] sm:$0x1] %v745_v23 }
  0xb7   :  { %858 = vst [vmem:[%s1688_s2 + $0x2] sm:$0x1] %v749_v5  ;;  %859 = vst [vmem:[%s1688_s2 + $0x3] sm:$0x1] %v753_v61 }
  0xb8   :  { %765 = vsyncpa [#allocation3], 1 }

</bundles_post_ra>
